<compile_context>
chip_gen: v7x
topology: tpu7x:2x2x1
jax: 0.10.0
libtpu: 0.0.40
codegen_flags: <defaults>
</compile_context>

<pallas_src>
import functools
import math

import jax
import jax.numpy as jnp
from jax.experimental import pallas as pl
from jax.experimental.pallas import tpu as pltpu

LN_EPS = 1e-5
NEG_INF = -1e9  # stand-in for masked_fill(-inf); identical when >=1 valid key


# ----------------------------- kernel helpers ------------------------------
def _row(mat2d, i):
    """Row i of a [N, D] array as [1, 1, D] (broadcastable bias / LN param)."""
    return mat2d[i:i + 1, :][None]


def _layer_norm(h, g, b):
    mu = jnp.mean(h, axis=-1, keepdims=True)
    var = jnp.mean(jnp.square(h - mu), axis=-1, keepdims=True)
    return (h - mu) * jax.lax.rsqrt(var + LN_EPS) * g + b


def _proj(h, w_bf16, bias):
    """h: [B, L, Din] f32, w: [Din, Dout] bf16, bias: [1, 1, Dout] f32."""
    B, L, Din = h.shape
    y = jnp.dot(h.reshape(B * L, Din).astype(jnp.bfloat16), w_bf16,
                preferred_element_type=jnp.float32)
    return y.reshape(B, L, w_bf16.shape[1]) + bias


def _mha(q_in, kv_in, wattn_ref, bat, base, neg_key, heads):
    """Multi-head attention.
    q_in [B,Tq,D] f32, kv_in [B,Tk,D] f32, wattn_ref block (1,8,D,D) bf16
    (rows base..base+3 = q,k,v,out), bat [8,D] f32,
    neg_key [B,1,Tk] additive key mask (0 = valid, -1e9 = pad)."""
    B, Tq, D = q_in.shape
    hd = D // heads
    scale = 1.0 / math.sqrt(hd)

    # full-D projections, MXU bf16 with f32 accumulation; scale folded into q.
    q = _proj(q_in, wattn_ref[0, base + 0], _row(bat, base + 0)) * scale
    k = _proj(kv_in, wattn_ref[0, base + 1], _row(bat, base + 1))
    v = _proj(kv_in, wattn_ref[0, base + 2], _row(bat, base + 2))

    # per-head attention core; softmax in f32, EUP approx reciprocal.
    # TODO(synk): flash-style streaming over Tk for long sequences.
    ctx = []
    for h in range(heads):
        sl = slice(h * hd, (h + 1) * hd)
        s = jnp.einsum('bqd,bkd->bqk',
                       q[:, :, sl].astype(jnp.bfloat16),
                       k[:, :, sl].astype(jnp.bfloat16),
                       preferred_element_type=jnp.float32)
        s = s + neg_key
        p = jnp.exp(s - jnp.max(s, axis=-1, keepdims=True))
        p = p * pl.reciprocal(jnp.sum(p, axis=-1, keepdims=True), approx=True)
        ctx.append(jnp.einsum('bqk,bkd->bqd',
                              p.astype(jnp.bfloat16),
                              v[:, :, sl].astype(jnp.bfloat16),
                              preferred_element_type=jnp.float32))
    ctx = jnp.concatenate(ctx, axis=-1)           # [B, Tq, D]
    # single K=D output projection (concat-then-project == per-head acc).
    return _proj(ctx, wattn_ref[0, base + 3], _row(bat, base + 3))


# ------------------------------ Pallas kernels ------------------------------
def decoder_stack_kernel(x_ref, tmask_ref, senc_ref, smask_ref,
                         wattn_ref, battn_ref, w1_ref, b1_ref,
                         w2_ref, b2_ref, lng_ref, lnb_ref,
                         o_ref, *, heads):
    """grid = (batch_tiles [parallel], layers [arbitrary]).
    o_ref is the resident activation for this batch tile across the layer
    axis (output BlockSpec index is constant in the layer coordinate)."""
    layer = pl.program_id(1)

    @pl.when(layer == 0)
    def _():
        o_ref[...] = x_ref[...]           # seed with embed + pos-enc block

    h = o_ref[...]                        # [bt, T, D] f32, carried across l
    senc = senc_ref[...]                  # [bt, S, D] f32
    neg_t = (1.0 - tmask_ref[...]) * NEG_INF   # [bt, 1, T]  (tgt_masks.eq(0))
    neg_s = (1.0 - smask_ref[...]) * NEG_INF   # [bt, 1, S]  (src_masks.eq(0))

    bat = battn_ref[0]                    # [8, D]  small -> load eagerly
    lng = lng_ref[0]                      # [3, D]
    lnb = lnb_ref[0]                      # [3, D]

    # self-attention block (residual + post layer-norm)
    h = _layer_norm(h + _mha(h, h, wattn_ref, bat, 0, neg_t, heads),
                    _row(lng, 0), _row(lnb, 0))
    # encoder (cross) attention block
    h = _layer_norm(h + _mha(h, senc, wattn_ref, bat, 4, neg_s, heads),
                    _row(lng, 1), _row(lnb, 1))
    # position-wise feed-forward block (bf16 MXU, f32 accumulate)
    bt, T, D = h.shape
    ff = jnp.maximum(
        jnp.dot(h.reshape(bt * T, D).astype(jnp.bfloat16), w1_ref[0],
                preferred_element_type=jnp.float32) + b1_ref[0], 0.0)
    ff = jnp.dot(ff.astype(jnp.bfloat16), w2_ref[0],
                 preferred_element_type=jnp.float32) + b2_ref[0]
    h = _layer_norm(h + ff.reshape(bt, T, D), _row(lng, 2), _row(lnb, 2))

    o_ref[...] = h


def head_kernel(x_ref, mask_ref, w_ref, b_ref, mu_ref, lv_ref):
    """Fused mu/logvar weight-norm heads: one [bt*T, D] x [D, 2D] matmul.
    Weight normalization is pre-applied in the wrapper (input independent)."""
    bt, T, D = x_ref.shape
    x2 = x_ref[...].reshape(bt * T, D).astype(jnp.bfloat16)
    y = jnp.dot(x2, w_ref[...], preferred_element_type=jnp.float32) + b_ref[...]
    y = y.reshape(bt, T, 2 * D) * mask_ref[...]     # [bt, T, 1] target mask
    mu_ref[...] = y[:, :, :D]
    lv_ref[...] = y[:, :, D:]


# ------------------------------- wrappers -----------------------------------
def run_decoder_stack(x, tgt_masks, src_enc, src_masks, dp, heads, batch_tile):
    B, T, D = x.shape
    S = src_enc.shape[1]
    L = dp["w_attn"].shape[0]
    Hff = dp["w1"].shape[2]
    assert B % batch_tile == 0
    nb = B // batch_tile
    bt = batch_tile

    tmask3 = tgt_masks.reshape(B, 1, T).astype(jnp.float32)
    smask3 = src_masks.reshape(B, 1, S).astype(jnp.float32)

    in_specs = [
        pl.BlockSpec((bt, T, D), lambda b, l: (b, 0, 0)),        # x (embedded)
        pl.BlockSpec((bt, 1, T), lambda b, l: (b, 0, 0)),        # tgt key mask
        pl.BlockSpec((bt, S, D), lambda b, l: (b, 0, 0)),        # src_enc
        pl.BlockSpec((bt, 1, S), lambda b, l: (b, 0, 0)),        # src key mask
        pl.BlockSpec((1, 8, D, D), lambda b, l: (l, 0, 0, 0)),   # attn weights
        pl.BlockSpec((1, 8, D), lambda b, l: (l, 0, 0)),         # attn biases
        pl.BlockSpec((1, D, Hff), lambda b, l: (l, 0, 0)),       # ffn w1
        pl.BlockSpec((1, 1, Hff), lambda b, l: (l, 0, 0)),       # ffn b1
        pl.BlockSpec((1, Hff, D), lambda b, l: (l, 0, 0)),       # ffn w2
        pl.BlockSpec((1, 1, D), lambda b, l: (l, 0, 0)),         # ffn b2
        pl.BlockSpec((1, 3, D), lambda b, l: (l, 0, 0)),         # ln gamma
        pl.BlockSpec((1, 3, D), lambda b, l: (l, 0, 0)),         # ln beta
    ]
    out_spec = pl.BlockSpec((bt, T, D), lambda b, l: (b, 0, 0))

    return pl.pallas_call(
        functools.partial(decoder_stack_kernel, heads=heads),
        out_shape=jax.ShapeDtypeStruct((B, T, D), jnp.float32),
        grid_spec=pltpu.PrefetchScalarGridSpec(
            num_scalar_prefetch=0, grid=(nb, L),
            in_specs=in_specs, out_specs=out_spec),
        compiler_params=pltpu.CompilerParams(
            dimension_semantics=("parallel", "arbitrary")),
    )(x, tmask3, src_enc, smask3,
      dp["w_attn"], dp["b_attn"], dp["w1"], dp["b1"], dp["w2"], dp["b2"],
      dp["ln_g"], dp["ln_b"])


def run_heads(x, tgt_masks, hp, batch_tile):
    B, T, D = x.shape
    assert B % batch_tile == 0
    nb = B // batch_tile
    bt = batch_tile
    mask3 = tgt_masks.reshape(B, T, 1).astype(jnp.float32)

    act_spec = pl.BlockSpec((bt, T, D), lambda b: (b, 0, 0))
    return pl.pallas_call(
        head_kernel,
        out_shape=(jax.ShapeDtypeStruct((B, T, D), jnp.float32),
                   jax.ShapeDtypeStruct((B, T, D), jnp.float32)),
        grid_spec=pltpu.PrefetchScalarGridSpec(
            num_scalar_prefetch=0, grid=(nb,),
            in_specs=[act_spec,
                      pl.BlockSpec((bt, T, 1), lambda b: (b, 0, 0)),
                      pl.BlockSpec((D, 2 * D), lambda b: (0, 0)),
                      pl.BlockSpec((1, 2 * D), lambda b: (0, 0))],
            out_specs=(act_spec, act_spec)),
        compiler_params=pltpu.CompilerParams(
            dimension_semantics=("parallel",)),
    )(x, mask3, hp["w"], hp["b"])


# --------------------------- plain-JAX glue ----------------------------------
def sinusoidal_table(num_emb, dim, padding_idx):
    half = dim // 2
    scale = math.log(10000.0) / (half - 1)
    freq = jnp.exp(jnp.arange(half, dtype=jnp.float32) * -scale)
    pos = jnp.arange(num_emb, dtype=jnp.float32)[:, None] * freq[None, :]
    tab = jnp.concatenate([jnp.sin(pos), jnp.cos(pos)], axis=1)
    if dim % 2 == 1:
        tab = jnp.concatenate([tab, jnp.zeros((num_emb, 1), jnp.float32)], 1)
    return tab.at[padding_idx].set(0.0)


def make_positions(tokens, padding_idx):
    m = (tokens != padding_idx).astype(jnp.int32)
    return jnp.cumsum(m, axis=1) * m + padding_idx


def transformer_core_forward(tgt_sents, tgt_masks, src_enc, src_masks,
                             params, *, heads, padding_idx, batch_tile=1):
    D = params["embed"].shape[1]
    embed_scale = math.sqrt(D)
    # glue: embedding gather + positional-encoding gather
    x = embed_scale * params["embed"][tgt_sents]
    # dropout2d(p=dropword) is identity in eval mode
    x = x + params["pos_table"][make_positions(tgt_sents, padding_idx)]
    # dropout(p=0.2) is identity in eval mode
    x = run_decoder_stack(x, tgt_masks, src_enc, src_masks,
                          params["dec"], heads, batch_tile)
    return run_heads(x, tgt_masks, params["head"], batch_tile)


# ------------------------------ param init ----------------------------------
def init_layer(k, D, H):
    k1, k2, k3 = jax.random.split(k, 3)
    return dict(
        # rows 0..3 = self-attn (q,k,v,out), rows 4..7 = cross-attn (q,k,v,out)
        w_attn=jax.random.normal(k1, (8, D, D), jnp.float32) * (D ** -0.5),
        b_attn=jnp.zeros((8, D), jnp.float32),
        w1=jax.random.normal(k2, (D, H), jnp.float32) * (D ** -0.5),
        b1=jnp.zeros((1, H), jnp.float32),
        w2=jax.random.normal(k3, (H, D), jnp.float32) * (H ** -0.5),
        b2=jnp.zeros((1, D), jnp.float32),
        ln_g=jnp.ones((3, D), jnp.float32),
        ln_b=jnp.zeros((3, D), jnp.float32),
    )


def stack_decoder_params(layers):
    """Stack per-layer params with a leading layer axis; matmul weights bf16."""
    def st(name):
        return jnp.stack([lp[name] for lp in layers], axis=0)
    return dict(
        w_attn=st("w_attn").astype(jnp.bfloat16),   # [L, 8, D, D]
        b_attn=st("b_attn"),                        # [L, 8, D]
        w1=st("w1").astype(jnp.bfloat16),           # [L, D, H]
        b1=st("b1"),                                # [L, 1, H]
        w2=st("w2").astype(jnp.bfloat16),           # [L, H, D]
        b2=st("b2"),                                # [L, 1, D]
        ln_g=st("ln_g"),                            # [L, 3, D]
        ln_b=st("ln_b"),                            # [L, 3, D]
    )


def init_head(k, D):
    k1, k2 = jax.random.split(k)
    v_mu = jax.random.normal(k1, (D, D), jnp.float32) * 0.05
    v_lv = jax.random.normal(k2, (D, D), jnp.float32) * 0.05
    # nn.utils.weight_norm init: g = ||v|| so that W == v initially
    g_mu = jnp.sqrt(jnp.sum(v_mu * v_mu, axis=1, keepdims=True))
    g_lv = jnp.sqrt(jnp.sum(v_lv * v_lv, axis=1, keepdims=True))
    return dict(v_mu=v_mu, g_mu=g_mu, b_mu=jnp.zeros((1, D), jnp.float32),
                v_lv=v_lv, g_lv=g_lv, b_lv=jnp.zeros((1, D), jnp.float32))


def prepare_head_params(hp):
    """Hoist weight-norm (input independent) + fuse mu/logvar into [D, 2D]."""
    def wn(v, g):   # v [Dout, Din], g [Dout, 1]; norm over input dim (dim=0 wn)
        norm = jnp.sqrt(jnp.sum(v * v, axis=1, keepdims=True))
        return (v * (g / norm)).T                   # [Din, Dout]
    w_cat = jnp.concatenate([wn(hp["v_mu"], hp["g_mu"]),
                             wn(hp["v_lv"], hp["g_lv"])], axis=1)
    b_cat = jnp.concatenate([hp["b_mu"], hp["b_lv"]], axis=1)   # [1, 2D]
    return dict(w=w_cat.astype(jnp.bfloat16), b=b_cat)


def init_params(key, *, vocab, D, H, num_layers, padding_idx, max_length):
    keys = jax.random.split(key, num_layers + 2)
    embed = jax.random.normal(keys[0], (vocab, D), jnp.float32) * (D ** -0.5)
    embed = embed.at[padding_idx].set(0.0)
    layers = [init_layer(keys[1 + i], D, H) for i in range(num_layers)]
    return dict(
        embed=embed,
        pos_table=sinusoidal_table(max_length + padding_idx + 2, D, padding_idx),
        dec=stack_decoder_params(layers),
        head=prepare_head_params(init_head(keys[-1], D)),
    )


# ---------------------------------- main -------------------------------------
if __name__ == "__main__":
    B, T, S = 2, 8, 12
    D, H_FFN, HEADS, LAYERS = 32, 64, 4, 2
    VOCAB, PAD, MAX_LEN = 20, 0, 100

    key = jax.random.PRNGKey(0)
    k_tok, k_src, k_par = jax.random.split(key, 3)

    tgt_sents = jax.random.randint(k_tok, (B, T), 1, VOCAB)
    tgt_sents = tgt_sents.at[1, 6:].set(PAD)              # some target padding
    tgt_masks = (tgt_sents != PAD).astype(jnp.float32)    # [B, T], 1 = valid
    src_enc = jax.random.normal(k_src, (B, S, D), jnp.float32)
    src_masks = jnp.ones((B, S), jnp.float32).at[1, 9:].set(0.0)

    params = init_params(k_par, vocab=VOCAB, D=D, H=H_FFN,
                         num_layers=LAYERS, padding_idx=PAD,
                         max_length=MAX_LEN)

    mu, logvar = transformer_core_forward(
        tgt_sents, tgt_masks, src_enc, src_masks, params,
        heads=HEADS, padding_idx=PAD, batch_tile=1)
    jax.block_until_ready((mu, logvar))

    assert mu.shape == (B, T, D) and logvar.shape == (B, T, D)
    assert bool(jnp.isfinite(mu).all()) and bool(jnp.isfinite(logvar).all())
    # padded target positions must be exactly zero in both outputs
    assert float(jnp.abs(mu[1, 6:]).max()) == 0.0
    assert float(jnp.abs(logvar[1, 6:]).max()) == 0.0
    print("KERNEL_OK")
</pallas_src>

<mosaic_0001>
module attributes {stable_mosaic.version = 11 : i64} {
  func.func @decoder_stack_kernel(%arg0: i32, %arg1: i32, %arg2: memref<1x8x32xf32, #tpu.memory_space<vmem>>, %arg3: memref<1x1x8xf32, #tpu.memory_space<vmem>>, %arg4: memref<1x12x32xf32, #tpu.memory_space<vmem>>, %arg5: memref<1x1x12xf32, #tpu.memory_space<vmem>>, %arg6: memref<1x8x32x32xbf16, #tpu.memory_space<vmem>>, %arg7: memref<1x8x32xf32, #tpu.memory_space<vmem>>, %arg8: memref<1x32x64xbf16, #tpu.memory_space<vmem>>, %arg9: memref<1x1x64xf32, #tpu.memory_space<vmem>>, %arg10: memref<1x64x32xbf16, #tpu.memory_space<vmem>>, %arg11: memref<1x1x32xf32, #tpu.memory_space<vmem>>, %arg12: memref<1x3x32xf32, #tpu.memory_space<vmem>>, %arg13: memref<1x3x32xf32, #tpu.memory_space<vmem>>, %arg14: memref<1x8x32xf32, #tpu.memory_space<vmem>>) attributes {dimension_semantics = [#tpu.dimension_semantics<parallel>, #tpu.dimension_semantics<arbitrary>], iteration_bounds = array<i64: 2, 2>, scalar_prefetch = 0 : i64, scratch_operands = 0 : i64, tpu.core_type = #tpu.core_type<tc>, window_params = [{transform_indices = @transform_0, window_bounds = array<i64: 1, 8, 32>}, {transform_indices = @transform_1, window_bounds = array<i64: 1, 1, 8>}, {transform_indices = @transform_2, window_bounds = array<i64: 1, 12, 32>}, {transform_indices = @transform_3, window_bounds = array<i64: 1, 1, 12>}, {transform_indices = @transform_4, window_bounds = array<i64: 1, 8, 32, 32>}, {transform_indices = @transform_5, window_bounds = array<i64: 1, 8, 32>}, {transform_indices = @transform_6, window_bounds = array<i64: 1, 32, 64>}, {transform_indices = @transform_7, window_bounds = array<i64: 1, 1, 64>}, {transform_indices = @transform_8, window_bounds = array<i64: 1, 64, 32>}, {transform_indices = @transform_9, window_bounds = array<i64: 1, 1, 32>}, {transform_indices = @transform_10, window_bounds = array<i64: 1, 3, 32>}, {transform_indices = @transform_11, window_bounds = array<i64: 1, 3, 32>}, {transform_indices = @transform_12, window_bounds = array<i64: 1, 8, 32>}]} {
    %c0_i32 = arith.constant 0 : i32
    %0 = arith.cmpi eq, %arg1, %c0_i32 : i32
    %1 = arith.extui %0 : i1 to i32
    %c0_i32_0 = arith.constant 0 : i32
    %2 = arith.cmpi ne, %1, %c0_i32_0 : i32
    scf.if %2 {
      %c0_124 = arith.constant 0 : index
      %c0_125 = arith.constant 0 : index
      %c0_126 = arith.constant 0 : index
      %377 = vector.load %arg2[%c0_124, %c0_125, %c0_126] : memref<1x8x32xf32, #tpu.memory_space<vmem>>, vector<1x8x32xf32>
      %c0_127 = arith.constant 0 : index
      %c0_128 = arith.constant 0 : index
      %c0_129 = arith.constant 0 : index
      %378 = vector.load %arg14[%c0_127, %c0_128, %c0_129] : memref<1x8x32xf32, #tpu.memory_space<vmem>>, vector<1x8x32xf32>
      tpu.vector_store %arg14[%c0_127, %c0_128, %c0_129], %377 {strides = array<i32>} : memref<1x8x32xf32, #tpu.memory_space<vmem>>, vector<1x8x32xf32>,
    } else {
    }
    %c0 = arith.constant 0 : index
    %c0_1 = arith.constant 0 : index
    %c0_2 = arith.constant 0 : index
    %3 = vector.load %arg14[%c0, %c0_1, %c0_2] : memref<1x8x32xf32, #tpu.memory_space<vmem>>, vector<1x8x32xf32>
    %c0_3 = arith.constant 0 : index
    %c0_4 = arith.constant 0 : index
    %c0_5 = arith.constant 0 : index
    %4 = vector.load %arg4[%c0_3, %c0_4, %c0_5] : memref<1x12x32xf32, #tpu.memory_space<vmem>>, vector<1x12x32xf32>
    %c0_6 = arith.constant 0 : index
    %c0_7 = arith.constant 0 : index
    %c0_8 = arith.constant 0 : index
    %5 = vector.load %arg3[%c0_6, %c0_7, %c0_8] : memref<1x1x8xf32, #tpu.memory_space<vmem>>, vector<1x1x8xf32>
    %cst = arith.constant 1.000000e+00 : f32
    %6 = vector.broadcast %cst : f32 to vector<1x1x8xf32>
    %7 = arith.subf %6, %5 : vector<1x1x8xf32>
    %cst_9 = arith.constant -1.000000e+09 : f32
    %8 = vector.broadcast %cst_9 : f32 to vector<1x1x8xf32>
    %9 = arith.mulf %7, %8 : vector<1x1x8xf32>
    %c0_10 = arith.constant 0 : index
    %c0_11 = arith.constant 0 : index
    %c0_12 = arith.constant 0 : index
    %10 = vector.load %arg5[%c0_10, %c0_11, %c0_12] : memref<1x1x12xf32, #tpu.memory_space<vmem>>, vector<1x1x12xf32>
    %cst_13 = arith.constant 1.000000e+00 : f32
    %11 = vector.broadcast %cst_13 : f32 to vector<1x1x12xf32>
    %12 = arith.subf %11, %10 : vector<1x1x12xf32>
    %cst_14 = arith.constant -1.000000e+09 : f32
    %13 = vector.broadcast %cst_14 : f32 to vector<1x1x12xf32>
    %14 = arith.mulf %12, %13 : vector<1x1x12xf32>
    %c0_15 = arith.constant 0 : index
    %c0_16 = arith.constant 0 : index
    %c0_17 = arith.constant 0 : index
    %15 = vector.load %arg7[%c0_15, %c0_16, %c0_17] : memref<1x8x32xf32, #tpu.memory_space<vmem>>, vector<1x8x32xf32>
    %16 = vector.shape_cast %15 : vector<1x8x32xf32> to vector<8x32xf32>
    %c0_18 = arith.constant 0 : index
    %c0_19 = arith.constant 0 : index
    %c0_20 = arith.constant 0 : index
    %17 = vector.load %arg12[%c0_18, %c0_19, %c0_20] : memref<1x3x32xf32, #tpu.memory_space<vmem>>, vector<1x3x32xf32>
    %18 = vector.shape_cast %17 : vector<1x3x32xf32> to vector<3x32xf32>
    %c0_21 = arith.constant 0 : index
    %c0_22 = arith.constant 0 : index
    %c0_23 = arith.constant 0 : index
    %19 = vector.load %arg13[%c0_21, %c0_22, %c0_23] : memref<1x3x32xf32, #tpu.memory_space<vmem>>, vector<1x3x32xf32>
    %20 = vector.shape_cast %19 : vector<1x3x32xf32> to vector<3x32xf32>
    %c0_24 = arith.constant 0 : index
    %c0_25 = arith.constant 0 : index
    %c0_26 = arith.constant 0 : index
    %c0_27 = arith.constant 0 : index
    %21 = vector.load %arg6[%c0_24, %c0_25, %c0_26, %c0_27] : memref<1x8x32x32xbf16, #tpu.memory_space<vmem>>, vector<1x1x32x32xbf16>
    %22 = vector.shape_cast %21 : vector<1x1x32x32xbf16> to vector<32x32xbf16>
    %23 = vector.extract_strided_slice %16 {offsets = [0, 0], sizes = [1, 32], strides = [1, 1]} : vector<8x32xf32> to vector<1x32xf32>
    %24 = vector.shape_cast %23 : vector<1x32xf32> to vector<1x1x32xf32>
    %25 = vector.shape_cast %3 : vector<1x8x32xf32> to vector<8x32xf32>
    %26 = arith.truncf %25 : vector<8x32xf32> to vector<8x32xbf16>
    %cst_28 = arith.constant dense<0.000000e+00> : vector<8x32xf32>
    %27 = tpu.matmul %26, %22, %cst_28 {dimension_numbers = #tpu.dot_dimension_numbers<[1], [0], [0], [1], [0, 0, 1, 1], [], []>} : vector<8x32xbf16>, vector<32x32xbf16>, vector<8x32xf32> -> vector<8x32xf32>
    %28 = vector.shape_cast %27 : vector<8x32xf32> to vector<1x8x32xf32>
    %29 = vector.broadcast %24 : vector<1x1x32xf32> to vector<1x8x32xf32>
    %30 = arith.addf %28, %29 : vector<1x8x32xf32>
    %cst_29 = arith.constant 0.353553385 : f32
    %31 = vector.broadcast %cst_29 : f32 to vector<1x8x32xf32>
    %32 = arith.mulf %30, %31 : vector<1x8x32xf32>
    %c0_30 = arith.constant 0 : index
    %c1 = arith.constant 1 : index
    %c0_31 = arith.constant 0 : index
    %c0_32 = arith.constant 0 : index
    %33 = vector.load %arg6[%c0_30, %c1, %c0_31, %c0_32] : memref<1x8x32x32xbf16, #tpu.memory_space<vmem>>, vector<1x1x32x32xbf16>
    %34 = vector.shape_cast %33 : vector<1x1x32x32xbf16> to vector<32x32xbf16>
    %35 = vector.extract_strided_slice %16 {offsets = [1, 0], sizes = [1, 32], strides = [1, 1]} : vector<8x32xf32> to vector<1x32xf32>
    %36 = vector.shape_cast %35 : vector<1x32xf32> to vector<1x1x32xf32>
    %37 = vector.shape_cast %3 : vector<1x8x32xf32> to vector<8x32xf32>
    %38 = arith.truncf %37 : vector<8x32xf32> to vector<8x32xbf16>
    %cst_33 = arith.constant dense<0.000000e+00> : vector<8x32xf32>
    %39 = tpu.matmul %38, %34, %cst_33 {dimension_numbers = #tpu.dot_dimension_numbers<[1], [0], [0], [1], [0, 0, 1, 1], [], []>} : vector<8x32xbf16>, vector<32x32xbf16>, vector<8x32xf32> -> vector<8x32xf32>
    %40 = vector.shape_cast %39 : vector<8x32xf32> to vector<1x8x32xf32>
    %41 = vector.broadcast %36 : vector<1x1x32xf32> to vector<1x8x32xf32>
    %42 = arith.addf %40, %41 : vector<1x8x32xf32>
    %c0_34 = arith.constant 0 : index
    %c2 = arith.constant 2 : index
    %c0_35 = arith.constant 0 : index
    %c0_36 = arith.constant 0 : index
    %43 = vector.load %arg6[%c0_34, %c2, %c0_35, %c0_36] : memref<1x8x32x32xbf16, #tpu.memory_space<vmem>>, vector<1x1x32x32xbf16>
    %44 = vector.shape_cast %43 : vector<1x1x32x32xbf16> to vector<32x32xbf16>
    %45 = vector.extract_strided_slice %16 {offsets = [2, 0], sizes = [1, 32], strides = [1, 1]} : vector<8x32xf32> to vector<1x32xf32>
    %46 = vector.shape_cast %45 : vector<1x32xf32> to vector<1x1x32xf32>
    %47 = vector.shape_cast %3 : vector<1x8x32xf32> to vector<8x32xf32>
    %48 = arith.truncf %47 : vector<8x32xf32> to vector<8x32xbf16>
    %cst_37 = arith.constant dense<0.000000e+00> : vector<8x32xf32>
    %49 = tpu.matmul %48, %44, %cst_37 {dimension_numbers = #tpu.dot_dimension_numbers<[1], [0], [0], [1], [0, 0, 1, 1], [], []>} : vector<8x32xbf16>, vector<32x32xbf16>, vector<8x32xf32> -> vector<8x32xf32>
    %50 = vector.shape_cast %49 : vector<8x32xf32> to vector<1x8x32xf32>
    %51 = vector.broadcast %46 : vector<1x1x32xf32> to vector<1x8x32xf32>
    %52 = arith.addf %50, %51 : vector<1x8x32xf32>
    %53 = vector.extract_strided_slice %32 {offsets = [0, 0, 0], sizes = [1, 8, 8], strides = [1, 1, 1]} : vector<1x8x32xf32> to vector<1x8x8xf32>
    %54 = arith.truncf %53 : vector<1x8x8xf32> to vector<1x8x8xbf16>
    %55 = vector.extract_strided_slice %42 {offsets = [0, 0, 0], sizes = [1, 8, 8], strides = [1, 1, 1]} : vector<1x8x32xf32> to vector<1x8x8xf32>
    %56 = arith.truncf %55 : vector<1x8x8xf32> to vector<1x8x8xbf16>
    "tpu.trace_start"() <{level = 10 : i32, message = "bqd,bkd->bqk"}> : () -> ()
    %cst_38 = arith.constant dense<0.000000e+00> : vector<1x8x8xf32>
    %57 = tpu.matmul %54, %56, %cst_38 {dimension_numbers = #tpu.dot_dimension_numbers<[2], [2], [1], [1], [0, 0, 0, 1, 1, 1], [0], [0]>} : vector<1x8x8xbf16>, vector<1x8x8xbf16>, vector<1x8x8xf32> -> vector<1x8x8xf32>
    "tpu.trace_stop"() : () -> ()
    %58 = vector.broadcast %9 : vector<1x1x8xf32> to vector<1x8x8xf32>
    %59 = arith.addf %57, %58 : vector<1x8x8xf32>
    %cst_39 = arith.constant dense<0xFF800000> : vector<1x8xf32>
    %60 = vector.multi_reduction <maximumf>, %59, %cst_39 [2] : vector<1x8x8xf32> to vector<1x8xf32>
    %61 = vector.shape_cast %60 : vector<1x8xf32> to vector<1x8x1xf32>
    %62 = vector.broadcast %61 : vector<1x8x1xf32> to vector<1x8x8xf32>
    %63 = arith.subf %59, %62 : vector<1x8x8xf32>
    %64 = math.exp %63 : vector<1x8x8xf32>
    %cst_40 = arith.constant dense<0.000000e+00> : vector<1x8xf32>
    %65 = vector.multi_reduction <add>, %64, %cst_40 [2] : vector<1x8x8xf32> to vector<1x8xf32>
    %66 = vector.shape_cast %65 : vector<1x8xf32> to vector<1x8x1xf32>
    %67 = tpu.reciprocal %66 {approx = true} : vector<1x8x1xf32> -> vector<1x8x1xf32>
    %68 = vector.broadcast %67 : vector<1x8x1xf32> to vector<1x8x8xf32>
    %69 = arith.mulf %64, %68 : vector<1x8x8xf32>
    %70 = arith.truncf %69 : vector<1x8x8xf32> to vector<1x8x8xbf16>
    %71 = vector.extract_strided_slice %52 {offsets = [0, 0, 0], sizes = [1, 8, 8], strides = [1, 1, 1]} : vector<1x8x32xf32> to vector<1x8x8xf32>
    %72 = arith.truncf %71 : vector<1x8x8xf32> to vector<1x8x8xbf16>
    "tpu.trace_start"() <{level = 10 : i32, message = "bqk,bkd->bqd"}> : () -> ()
    %cst_41 = arith.constant dense<0.000000e+00> : vector<1x8x8xf32>
    %73 = tpu.matmul %70, %72, %cst_41 {dimension_numbers = #tpu.dot_dimension_numbers<[2], [1], [1], [2], [0, 0, 0, 1, 1, 2], [0], [0]>} : vector<1x8x8xbf16>, vector<1x8x8xbf16>, vector<1x8x8xf32> -> vector<1x8x8xf32>
    "tpu.trace_stop"() : () -> ()
    %74 = vector.extract_strided_slice %32 {offsets = [0, 0, 8], sizes = [1, 8, 8], strides = [1, 1, 1]} : vector<1x8x32xf32> to vector<1x8x8xf32>
    %75 = arith.truncf %74 : vector<1x8x8xf32> to vector<1x8x8xbf16>
    %76 = vector.extract_strided_slice %42 {offsets = [0, 0, 8], sizes = [1, 8, 8], strides = [1, 1, 1]} : vector<1x8x32xf32> to vector<1x8x8xf32>
    %77 = arith.truncf %76 : vector<1x8x8xf32> to vector<1x8x8xbf16>
    "tpu.trace_start"() <{level = 10 : i32, message = "bqd,bkd->bqk"}> : () -> ()
    %cst_42 = arith.constant dense<0.000000e+00> : vector<1x8x8xf32>
    %78 = tpu.matmul %75, %77, %cst_42 {dimension_numbers = #tpu.dot_dimension_numbers<[2], [2], [1], [1], [0, 0, 0, 1, 1, 1], [0], [0]>} : vector<1x8x8xbf16>, vector<1x8x8xbf16>, vector<1x8x8xf32> -> vector<1x8x8xf32>
    "tpu.trace_stop"() : () -> ()
    %79 = vector.broadcast %9 : vector<1x1x8xf32> to vector<1x8x8xf32>
    %80 = arith.addf %78, %79 : vector<1x8x8xf32>
    %cst_43 = arith.constant dense<0xFF800000> : vector<1x8xf32>
    %81 = vector.multi_reduction <maximumf>, %80, %cst_43 [2] : vector<1x8x8xf32> to vector<1x8xf32>
    %82 = vector.shape_cast %81 : vector<1x8xf32> to vector<1x8x1xf32>
    %83 = vector.broadcast %82 : vector<1x8x1xf32> to vector<1x8x8xf32>
    %84 = arith.subf %80, %83 : vector<1x8x8xf32>
    %85 = math.exp %84 : vector<1x8x8xf32>
    %cst_44 = arith.constant dense<0.000000e+00> : vector<1x8xf32>
    %86 = vector.multi_reduction <add>, %85, %cst_44 [2] : vector<1x8x8xf32> to vector<1x8xf32>
    %87 = vector.shape_cast %86 : vector<1x8xf32> to vector<1x8x1xf32>
    %88 = tpu.reciprocal %87 {approx = true} : vector<1x8x1xf32> -> vector<1x8x1xf32>
    %89 = vector.broadcast %88 : vector<1x8x1xf32> to vector<1x8x8xf32>
    %90 = arith.mulf %85, %89 : vector<1x8x8xf32>
    %91 = arith.truncf %90 : vector<1x8x8xf32> to vector<1x8x8xbf16>
    %92 = vector.extract_strided_slice %52 {offsets = [0, 0, 8], sizes = [1, 8, 8], strides = [1, 1, 1]} : vector<1x8x32xf32> to vector<1x8x8xf32>
    %93 = arith.truncf %92 : vector<1x8x8xf32> to vector<1x8x8xbf16>
    "tpu.trace_start"() <{level = 10 : i32, message = "bqk,bkd->bqd"}> : () -> ()
    %cst_45 = arith.constant dense<0.000000e+00> : vector<1x8x8xf32>
    %94 = tpu.matmul %91, %93, %cst_45 {dimension_numbers = #tpu.dot_dimension_numbers<[2], [1], [1], [2], [0, 0, 0, 1, 1, 2], [0], [0]>} : vector<1x8x8xbf16>, vector<1x8x8xbf16>, vector<1x8x8xf32> -> vector<1x8x8xf32>
    "tpu.trace_stop"() : () -> ()
    %95 = vector.extract_strided_slice %32 {offsets = [0, 0, 16], sizes = [1, 8, 8], strides = [1, 1, 1]} : vector<1x8x32xf32> to vector<1x8x8xf32>
    %96 = arith.truncf %95 : vector<1x8x8xf32> to vector<1x8x8xbf16>
    %97 = vector.extract_strided_slice %42 {offsets = [0, 0, 16], sizes = [1, 8, 8], strides = [1, 1, 1]} : vector<1x8x32xf32> to vector<1x8x8xf32>
    %98 = arith.truncf %97 : vector<1x8x8xf32> to vector<1x8x8xbf16>
    "tpu.trace_start"() <{level = 10 : i32, message = "bqd,bkd->bqk"}> : () -> ()
    %cst_46 = arith.constant dense<0.000000e+00> : vector<1x8x8xf32>
    %99 = tpu.matmul %96, %98, %cst_46 {dimension_numbers = #tpu.dot_dimension_numbers<[2], [2], [1], [1], [0, 0, 0, 1, 1, 1], [0], [0]>} : vector<1x8x8xbf16>, vector<1x8x8xbf16>, vector<1x8x8xf32> -> vector<1x8x8xf32>
    "tpu.trace_stop"() : () -> ()
    %100 = vector.broadcast %9 : vector<1x1x8xf32> to vector<1x8x8xf32>
    %101 = arith.addf %99, %100 : vector<1x8x8xf32>
    %cst_47 = arith.constant dense<0xFF800000> : vector<1x8xf32>
    %102 = vector.multi_reduction <maximumf>, %101, %cst_47 [2] : vector<1x8x8xf32> to vector<1x8xf32>
    %103 = vector.shape_cast %102 : vector<1x8xf32> to vector<1x8x1xf32>
    %104 = vector.broadcast %103 : vector<1x8x1xf32> to vector<1x8x8xf32>
    %105 = arith.subf %101, %104 : vector<1x8x8xf32>
    %106 = math.exp %105 : vector<1x8x8xf32>
    %cst_48 = arith.constant dense<0.000000e+00> : vector<1x8xf32>
    %107 = vector.multi_reduction <add>, %106, %cst_48 [2] : vector<1x8x8xf32> to vector<1x8xf32>
    %108 = vector.shape_cast %107 : vector<1x8xf32> to vector<1x8x1xf32>
    %109 = tpu.reciprocal %108 {approx = true} : vector<1x8x1xf32> -> vector<1x8x1xf32>
    %110 = vector.broadcast %109 : vector<1x8x1xf32> to vector<1x8x8xf32>
    %111 = arith.mulf %106, %110 : vector<1x8x8xf32>
    %112 = arith.truncf %111 : vector<1x8x8xf32> to vector<1x8x8xbf16>
    %113 = vector.extract_strided_slice %52 {offsets = [0, 0, 16], sizes = [1, 8, 8], strides = [1, 1, 1]} : vector<1x8x32xf32> to vector<1x8x8xf32>
    %114 = arith.truncf %113 : vector<1x8x8xf32> to vector<1x8x8xbf16>
    "tpu.trace_start"() <{level = 10 : i32, message = "bqk,bkd->bqd"}> : () -> ()
    %cst_49 = arith.constant dense<0.000000e+00> : vector<1x8x8xf32>
    %115 = tpu.matmul %112, %114, %cst_49 {dimension_numbers = #tpu.dot_dimension_numbers<[2], [1], [1], [2], [0, 0, 0, 1, 1, 2], [0], [0]>} : vector<1x8x8xbf16>, vector<1x8x8xbf16>, vector<1x8x8xf32> -> vector<1x8x8xf32>
    "tpu.trace_stop"() : () -> ()
    %116 = vector.extract_strided_slice %32 {offsets = [0, 0, 24], sizes = [1, 8, 8], strides = [1, 1, 1]} : vector<1x8x32xf32> to vector<1x8x8xf32>
    %117 = arith.truncf %116 : vector<1x8x8xf32> to vector<1x8x8xbf16>
    %118 = vector.extract_strided_slice %42 {offsets = [0, 0, 24], sizes = [1, 8, 8], strides = [1, 1, 1]} : vector<1x8x32xf32> to vector<1x8x8xf32>
    %119 = arith.truncf %118 : vector<1x8x8xf32> to vector<1x8x8xbf16>
    "tpu.trace_start"() <{level = 10 : i32, message = "bqd,bkd->bqk"}> : () -> ()
    %cst_50 = arith.constant dense<0.000000e+00> : vector<1x8x8xf32>
    %120 = tpu.matmul %117, %119, %cst_50 {dimension_numbers = #tpu.dot_dimension_numbers<[2], [2], [1], [1], [0, 0, 0, 1, 1, 1], [0], [0]>} : vector<1x8x8xbf16>, vector<1x8x8xbf16>, vector<1x8x8xf32> -> vector<1x8x8xf32>
    "tpu.trace_stop"() : () -> ()
    %121 = vector.broadcast %9 : vector<1x1x8xf32> to vector<1x8x8xf32>
    %122 = arith.addf %120, %121 : vector<1x8x8xf32>
    %cst_51 = arith.constant dense<0xFF800000> : vector<1x8xf32>
    %123 = vector.multi_reduction <maximumf>, %122, %cst_51 [2] : vector<1x8x8xf32> to vector<1x8xf32>
    %124 = vector.shape_cast %123 : vector<1x8xf32> to vector<1x8x1xf32>
    %125 = vector.broadcast %124 : vector<1x8x1xf32> to vector<1x8x8xf32>
    %126 = arith.subf %122, %125 : vector<1x8x8xf32>
    %127 = math.exp %126 : vector<1x8x8xf32>
    %cst_52 = arith.constant dense<0.000000e+00> : vector<1x8xf32>
    %128 = vector.multi_reduction <add>, %127, %cst_52 [2] : vector<1x8x8xf32> to vector<1x8xf32>
    %129 = vector.shape_cast %128 : vector<1x8xf32> to vector<1x8x1xf32>
    %130 = tpu.reciprocal %129 {approx = true} : vector<1x8x1xf32> -> vector<1x8x1xf32>
    %131 = vector.broadcast %130 : vector<1x8x1xf32> to vector<1x8x8xf32>
    %132 = arith.mulf %127, %131 : vector<1x8x8xf32>
    %133 = arith.truncf %132 : vector<1x8x8xf32> to vector<1x8x8xbf16>
    %134 = vector.extract_strided_slice %52 {offsets = [0, 0, 24], sizes = [1, 8, 8], strides = [1, 1, 1]} : vector<1x8x32xf32> to vector<1x8x8xf32>
    %135 = arith.truncf %134 : vector<1x8x8xf32> to vector<1x8x8xbf16>
    "tpu.trace_start"() <{level = 10 : i32, message = "bqk,bkd->bqd"}> : () -> ()
    %cst_53 = arith.constant dense<0.000000e+00> : vector<1x8x8xf32>
    %136 = tpu.matmul %133, %135, %cst_53 {dimension_numbers = #tpu.dot_dimension_numbers<[2], [1], [1], [2], [0, 0, 0, 1, 1, 2], [0], [0]>} : vector<1x8x8xbf16>, vector<1x8x8xbf16>, vector<1x8x8xf32> -> vector<1x8x8xf32>
    "tpu.trace_stop"() : () -> ()
    %137 = tpu.concatenate %73, %94, %115, %136 in 2 : vector<1x8x8xf32>, vector<1x8x8xf32>, vector<1x8x8xf32>, vector<1x8x8xf32> -> vector<1x8x32xf32>
    %c0_54 = arith.constant 0 : index
    %c3 = arith.constant 3 : index
    %c0_55 = arith.constant 0 : index
    %c0_56 = arith.constant 0 : index
    %138 = vector.load %arg6[%c0_54, %c3, %c0_55, %c0_56] : memref<1x8x32x32xbf16, #tpu.memory_space<vmem>>, vector<1x1x32x32xbf16>
    %139 = vector.shape_cast %138 : vector<1x1x32x32xbf16> to vector<32x32xbf16>
    %140 = vector.extract_strided_slice %16 {offsets = [3, 0], sizes = [1, 32], strides = [1, 1]} : vector<8x32xf32> to vector<1x32xf32>
    %141 = vector.shape_cast %140 : vector<1x32xf32> to vector<1x1x32xf32>
    %142 = vector.shape_cast %137 : vector<1x8x32xf32> to vector<8x32xf32>
    %143 = arith.truncf %142 : vector<8x32xf32> to vector<8x32xbf16>
    %cst_57 = arith.constant dense<0.000000e+00> : vector<8x32xf32>
    %144 = tpu.matmul %143, %139, %cst_57 {dimension_numbers = #tpu.dot_dimension_numbers<[1], [0], [0], [1], [0, 0, 1, 1], [], []>} : vector<8x32xbf16>, vector<32x32xbf16>, vector<8x32xf32> -> vector<8x32xf32>
    %145 = vector.shape_cast %144 : vector<8x32xf32> to vector<1x8x32xf32>
    %146 = vector.broadcast %141 : vector<1x1x32xf32> to vector<1x8x32xf32>
    %147 = arith.addf %145, %146 : vector<1x8x32xf32>
    %148 = arith.addf %3, %147 : vector<1x8x32xf32>
    %149 = vector.extract_strided_slice %18 {offsets = [0, 0], sizes = [1, 32], strides = [1, 1]} : vector<3x32xf32> to vector<1x32xf32>
    %150 = vector.shape_cast %149 : vector<1x32xf32> to vector<1x1x32xf32>
    %151 = vector.extract_strided_slice %20 {offsets = [0, 0], sizes = [1, 32], strides = [1, 1]} : vector<3x32xf32> to vector<1x32xf32>
    %152 = vector.shape_cast %151 : vector<1x32xf32> to vector<1x1x32xf32>
    %cst_58 = arith.constant dense<0.000000e+00> : vector<1x8xf32>
    %153 = vector.multi_reduction <add>, %148, %cst_58 [2] : vector<1x8x32xf32> to vector<1x8xf32>
    %154 = vector.shape_cast %153 : vector<1x8xf32> to vector<1x8x1xf32>
    %cst_59 = arith.constant 3.200000e+01 : f32
    %155 = vector.broadcast %cst_59 : f32 to vector<1x8x1xf32>
    %156 = arith.divf %154, %155 : vector<1x8x1xf32>
    %157 = vector.broadcast %156 : vector<1x8x1xf32> to vector<1x8x32xf32>
    %158 = arith.subf %148, %157 : vector<1x8x32xf32>
    %159 = arith.mulf %158, %158 : vector<1x8x32xf32>
    %cst_60 = arith.constant dense<0.000000e+00> : vector<1x8xf32>
    %160 = vector.multi_reduction <add>, %159, %cst_60 [2] : vector<1x8x32xf32> to vector<1x8xf32>
    %161 = vector.shape_cast %160 : vector<1x8xf32> to vector<1x8x1xf32>
    %cst_61 = arith.constant 3.200000e+01 : f32
    %162 = vector.broadcast %cst_61 : f32 to vector<1x8x1xf32>
    %163 = arith.divf %161, %162 : vector<1x8x1xf32>
    %164 = vector.broadcast %156 : vector<1x8x1xf32> to vector<1x8x32xf32>
    %165 = arith.subf %148, %164 : vector<1x8x32xf32>
    %cst_62 = arith.constant 9.99999974E-6 : f32
    %166 = vector.broadcast %cst_62 : f32 to vector<1x8x1xf32>
    %167 = arith.addf %163, %166 : vector<1x8x1xf32>
    %168 = math.rsqrt %167 : vector<1x8x1xf32>
    %169 = vector.broadcast %168 : vector<1x8x1xf32> to vector<1x8x32xf32>
    %170 = arith.mulf %165, %169 : vector<1x8x32xf32>
    %171 = vector.broadcast %150 : vector<1x1x32xf32> to vector<1x8x32xf32>
    %172 = arith.mulf %170, %171 : vector<1x8x32xf32>
    %173 = vector.broadcast %152 : vector<1x1x32xf32> to vector<1x8x32xf32>
    %174 = arith.addf %172, %173 : vector<1x8x32xf32>
    %c0_63 = arith.constant 0 : index
    %c4 = arith.constant 4 : index
    %c0_64 = arith.constant 0 : index
    %c0_65 = arith.constant 0 : index
    %175 = vector.load %arg6[%c0_63, %c4, %c0_64, %c0_65] : memref<1x8x32x32xbf16, #tpu.memory_space<vmem>>, vector<1x1x32x32xbf16>
    %176 = vector.shape_cast %175 : vector<1x1x32x32xbf16> to vector<32x32xbf16>
    %177 = vector.extract_strided_slice %16 {offsets = [4, 0], sizes = [1, 32], strides = [1, 1]} : vector<8x32xf32> to vector<1x32xf32>
    %178 = vector.shape_cast %177 : vector<1x32xf32> to vector<1x1x32xf32>
    %179 = vector.shape_cast %174 : vector<1x8x32xf32> to vector<8x32xf32>
    %180 = arith.truncf %179 : vector<8x32xf32> to vector<8x32xbf16>
    %cst_66 = arith.constant dense<0.000000e+00> : vector<8x32xf32>
    %181 = tpu.matmul %180, %176, %cst_66 {dimension_numbers = #tpu.dot_dimension_numbers<[1], [0], [0], [1], [0, 0, 1, 1], [], []>} : vector<8x32xbf16>, vector<32x32xbf16>, vector<8x32xf32> -> vector<8x32xf32>
    %182 = vector.shape_cast %181 : vector<8x32xf32> to vector<1x8x32xf32>
    %183 = vector.broadcast %178 : vector<1x1x32xf32> to vector<1x8x32xf32>
    %184 = arith.addf %182, %183 : vector<1x8x32xf32>
    %cst_67 = arith.constant 0.353553385 : f32
    %185 = vector.broadcast %cst_67 : f32 to vector<1x8x32xf32>
    %186 = arith.mulf %184, %185 : vector<1x8x32xf32>
    %c0_68 = arith.constant 0 : index
    %c5 = arith.constant 5 : index
    %c0_69 = arith.constant 0 : index
    %c0_70 = arith.constant 0 : index
    %187 = vector.load %arg6[%c0_68, %c5, %c0_69, %c0_70] : memref<1x8x32x32xbf16, #tpu.memory_space<vmem>>, vector<1x1x32x32xbf16>
    %188 = vector.shape_cast %187 : vector<1x1x32x32xbf16> to vector<32x32xbf16>
    %189 = vector.extract_strided_slice %16 {offsets = [5, 0], sizes = [1, 32], strides = [1, 1]} : vector<8x32xf32> to vector<1x32xf32>
    %190 = vector.shape_cast %189 : vector<1x32xf32> to vector<1x1x32xf32>
    %191 = vector.shape_cast %4 : vector<1x12x32xf32> to vector<12x32xf32>
    %192 = arith.truncf %191 : vector<12x32xf32> to vector<12x32xbf16>
    %cst_71 = arith.constant dense<0.000000e+00> : vector<12x32xf32>
    %193 = tpu.matmul %192, %188, %cst_71 {dimension_numbers = #tpu.dot_dimension_numbers<[1], [0], [0], [1], [0, 0, 1, 1], [], []>} : vector<12x32xbf16>, vector<32x32xbf16>, vector<12x32xf32> -> vector<12x32xf32>
    %194 = vector.shape_cast %193 : vector<12x32xf32> to vector<1x12x32xf32>
    %195 = vector.broadcast %190 : vector<1x1x32xf32> to vector<1x12x32xf32>
    %196 = arith.addf %194, %195 : vector<1x12x32xf32>
    %c0_72 = arith.constant 0 : index
    %c6 = arith.constant 6 : index
    %c0_73 = arith.constant 0 : index
    %c0_74 = arith.constant 0 : index
    %197 = vector.load %arg6[%c0_72, %c6, %c0_73, %c0_74] : memref<1x8x32x32xbf16, #tpu.memory_space<vmem>>, vector<1x1x32x32xbf16>
    %198 = vector.shape_cast %197 : vector<1x1x32x32xbf16> to vector<32x32xbf16>
    %199 = vector.extract_strided_slice %16 {offsets = [6, 0], sizes = [1, 32], strides = [1, 1]} : vector<8x32xf32> to vector<1x32xf32>
    %200 = vector.shape_cast %199 : vector<1x32xf32> to vector<1x1x32xf32>
    %201 = vector.shape_cast %4 : vector<1x12x32xf32> to vector<12x32xf32>
    %202 = arith.truncf %201 : vector<12x32xf32> to vector<12x32xbf16>
    %cst_75 = arith.constant dense<0.000000e+00> : vector<12x32xf32>
    %203 = tpu.matmul %202, %198, %cst_75 {dimension_numbers = #tpu.dot_dimension_numbers<[1], [0], [0], [1], [0, 0, 1, 1], [], []>} : vector<12x32xbf16>, vector<32x32xbf16>, vector<12x32xf32> -> vector<12x32xf32>
    %204 = vector.shape_cast %203 : vector<12x32xf32> to vector<1x12x32xf32>
    %205 = vector.broadcast %200 : vector<1x1x32xf32> to vector<1x12x32xf32>
    %206 = arith.addf %204, %205 : vector<1x12x32xf32>
    %207 = vector.extract_strided_slice %186 {offsets = [0, 0, 0], sizes = [1, 8, 8], strides = [1, 1, 1]} : vector<1x8x32xf32> to vector<1x8x8xf32>
    %208 = arith.truncf %207 : vector<1x8x8xf32> to vector<1x8x8xbf16>
    %209 = vector.extract_strided_slice %196 {offsets = [0, 0, 0], sizes = [1, 12, 8], strides = [1, 1, 1]} : vector<1x12x32xf32> to vector<1x12x8xf32>
    %210 = arith.truncf %209 : vector<1x12x8xf32> to vector<1x12x8xbf16>
    "tpu.trace_start"() <{level = 10 : i32, message = "bqd,bkd->bqk"}> : () -> ()
    %cst_76 = arith.constant dense<0.000000e+00> : vector<1x8x12xf32>
    %211 = tpu.matmul %208, %210, %cst_76 {dimension_numbers = #tpu.dot_dimension_numbers<[2], [2], [1], [1], [0, 0, 0, 1, 1, 1], [0], [0]>} : vector<1x8x8xbf16>, vector<1x12x8xbf16>, vector<1x8x12xf32> -> vector<1x8x12xf32>
    "tpu.trace_stop"() : () -> ()
    %212 = vector.broadcast %14 : vector<1x1x12xf32> to vector<1x8x12xf32>
    %213 = arith.addf %211, %212 : vector<1x8x12xf32>
    %cst_77 = arith.constant dense<0xFF800000> : vector<1x8xf32>
    %214 = vector.multi_reduction <maximumf>, %213, %cst_77 [2] : vector<1x8x12xf32> to vector<1x8xf32>
    %215 = vector.shape_cast %214 : vector<1x8xf32> to vector<1x8x1xf32>
    %216 = vector.broadcast %215 : vector<1x8x1xf32> to vector<1x8x12xf32>
    %217 = arith.subf %213, %216 : vector<1x8x12xf32>
    %218 = math.exp %217 : vector<1x8x12xf32>
    %cst_78 = arith.constant dense<0.000000e+00> : vector<1x8xf32>
    %219 = vector.multi_reduction <add>, %218, %cst_78 [2] : vector<1x8x12xf32> to vector<1x8xf32>
    %220 = vector.shape_cast %219 : vector<1x8xf32> to vector<1x8x1xf32>
    %221 = tpu.reciprocal %220 {approx = true} : vector<1x8x1xf32> -> vector<1x8x1xf32>
    %222 = vector.broadcast %221 : vector<1x8x1xf32> to vector<1x8x12xf32>
    %223 = arith.mulf %218, %222 : vector<1x8x12xf32>
    %224 = arith.truncf %223 : vector<1x8x12xf32> to vector<1x8x12xbf16>
    %225 = vector.extract_strided_slice %206 {offsets = [0, 0, 0], sizes = [1, 12, 8], strides = [1, 1, 1]} : vector<1x12x32xf32> to vector<1x12x8xf32>
    %226 = arith.truncf %225 : vector<1x12x8xf32> to vector<1x12x8xbf16>
    "tpu.trace_start"() <{level = 10 : i32, message = "bqk,bkd->bqd"}> : () -> ()
    %cst_79 = arith.constant dense<0.000000e+00> : vector<1x8x8xf32>
    %227 = tpu.matmul %224, %226, %cst_79 {dimension_numbers = #tpu.dot_dimension_numbers<[2], [1], [1], [2], [0, 0, 0, 1, 1, 2], [0], [0]>} : vector<1x8x12xbf16>, vector<1x12x8xbf16>, vector<1x8x8xf32> -> vector<1x8x8xf32>
    "tpu.trace_stop"() : () -> ()
    %228 = vector.extract_strided_slice %186 {offsets = [0, 0, 8], sizes = [1, 8, 8], strides = [1, 1, 1]} : vector<1x8x32xf32> to vector<1x8x8xf32>
    %229 = arith.truncf %228 : vector<1x8x8xf32> to vector<1x8x8xbf16>
    %230 = vector.extract_strided_slice %196 {offsets = [0, 0, 8], sizes = [1, 12, 8], strides = [1, 1, 1]} : vector<1x12x32xf32> to vector<1x12x8xf32>
    %231 = arith.truncf %230 : vector<1x12x8xf32> to vector<1x12x8xbf16>
    "tpu.trace_start"() <{level = 10 : i32, message = "bqd,bkd->bqk"}> : () -> ()
    %cst_80 = arith.constant dense<0.000000e+00> : vector<1x8x12xf32>
    %232 = tpu.matmul %229, %231, %cst_80 {dimension_numbers = #tpu.dot_dimension_numbers<[2], [2], [1], [1], [0, 0, 0, 1, 1, 1], [0], [0]>} : vector<1x8x8xbf16>, vector<1x12x8xbf16>, vector<1x8x12xf32> -> vector<1x8x12xf32>
    "tpu.trace_stop"() : () -> ()
    %233 = vector.broadcast %14 : vector<1x1x12xf32> to vector<1x8x12xf32>
    %234 = arith.addf %232, %233 : vector<1x8x12xf32>
    %cst_81 = arith.constant dense<0xFF800000> : vector<1x8xf32>
    %235 = vector.multi_reduction <maximumf>, %234, %cst_81 [2] : vector<1x8x12xf32> to vector<1x8xf32>
    %236 = vector.shape_cast %235 : vector<1x8xf32> to vector<1x8x1xf32>
    %237 = vector.broadcast %236 : vector<1x8x1xf32> to vector<1x8x12xf32>
    %238 = arith.subf %234, %237 : vector<1x8x12xf32>
    %239 = math.exp %238 : vector<1x8x12xf32>
    %cst_82 = arith.constant dense<0.000000e+00> : vector<1x8xf32>
    %240 = vector.multi_reduction <add>, %239, %cst_82 [2] : vector<1x8x12xf32> to vector<1x8xf32>
    %241 = vector.shape_cast %240 : vector<1x8xf32> to vector<1x8x1xf32>
    %242 = tpu.reciprocal %241 {approx = true} : vector<1x8x1xf32> -> vector<1x8x1xf32>
    %243 = vector.broadcast %242 : vector<1x8x1xf32> to vector<1x8x12xf32>
    %244 = arith.mulf %239, %243 : vector<1x8x12xf32>
    %245 = arith.truncf %244 : vector<1x8x12xf32> to vector<1x8x12xbf16>
    %246 = vector.extract_strided_slice %206 {offsets = [0, 0, 8], sizes = [1, 12, 8], strides = [1, 1, 1]} : vector<1x12x32xf32> to vector<1x12x8xf32>
    %247 = arith.truncf %246 : vector<1x12x8xf32> to vector<1x12x8xbf16>
    "tpu.trace_start"() <{level = 10 : i32, message = "bqk,bkd->bqd"}> : () -> ()
    %cst_83 = arith.constant dense<0.000000e+00> : vector<1x8x8xf32>
    %248 = tpu.matmul %245, %247, %cst_83 {dimension_numbers = #tpu.dot_dimension_numbers<[2], [1], [1], [2], [0, 0, 0, 1, 1, 2], [0], [0]>} : vector<1x8x12xbf16>, vector<1x12x8xbf16>, vector<1x8x8xf32> -> vector<1x8x8xf32>
    "tpu.trace_stop"() : () -> ()
    %249 = vector.extract_strided_slice %186 {offsets = [0, 0, 16], sizes = [1, 8, 8], strides = [1, 1, 1]} : vector<1x8x32xf32> to vector<1x8x8xf32>
    %250 = arith.truncf %249 : vector<1x8x8xf32> to vector<1x8x8xbf16>
    %251 = vector.extract_strided_slice %196 {offsets = [0, 0, 16], sizes = [1, 12, 8], strides = [1, 1, 1]} : vector<1x12x32xf32> to vector<1x12x8xf32>
    %252 = arith.truncf %251 : vector<1x12x8xf32> to vector<1x12x8xbf16>
    "tpu.trace_start"() <{level = 10 : i32, message = "bqd,bkd->bqk"}> : () -> ()
    %cst_84 = arith.constant dense<0.000000e+00> : vector<1x8x12xf32>
    %253 = tpu.matmul %250, %252, %cst_84 {dimension_numbers = #tpu.dot_dimension_numbers<[2], [2], [1], [1], [0, 0, 0, 1, 1, 1], [0], [0]>} : vector<1x8x8xbf16>, vector<1x12x8xbf16>, vector<1x8x12xf32> -> vector<1x8x12xf32>
    "tpu.trace_stop"() : () -> ()
    %254 = vector.broadcast %14 : vector<1x1x12xf32> to vector<1x8x12xf32>
    %255 = arith.addf %253, %254 : vector<1x8x12xf32>
    %cst_85 = arith.constant dense<0xFF800000> : vector<1x8xf32>
    %256 = vector.multi_reduction <maximumf>, %255, %cst_85 [2] : vector<1x8x12xf32> to vector<1x8xf32>
    %257 = vector.shape_cast %256 : vector<1x8xf32> to vector<1x8x1xf32>
    %258 = vector.broadcast %257 : vector<1x8x1xf32> to vector<1x8x12xf32>
    %259 = arith.subf %255, %258 : vector<1x8x12xf32>
    %260 = math.exp %259 : vector<1x8x12xf32>
    %cst_86 = arith.constant dense<0.000000e+00> : vector<1x8xf32>
    %261 = vector.multi_reduction <add>, %260, %cst_86 [2] : vector<1x8x12xf32> to vector<1x8xf32>
    %262 = vector.shape_cast %261 : vector<1x8xf32> to vector<1x8x1xf32>
    %263 = tpu.reciprocal %262 {approx = true} : vector<1x8x1xf32> -> vector<1x8x1xf32>
    %264 = vector.broadcast %263 : vector<1x8x1xf32> to vector<1x8x12xf32>
    %265 = arith.mulf %260, %264 : vector<1x8x12xf32>
    %266 = arith.truncf %265 : vector<1x8x12xf32> to vector<1x8x12xbf16>
    %267 = vector.extract_strided_slice %206 {offsets = [0, 0, 16], sizes = [1, 12, 8], strides = [1, 1, 1]} : vector<1x12x32xf32> to vector<1x12x8xf32>
    %268 = arith.truncf %267 : vector<1x12x8xf32> to vector<1x12x8xbf16>
    "tpu.trace_start"() <{level = 10 : i32, message = "bqk,bkd->bqd"}> : () -> ()
    %cst_87 = arith.constant dense<0.000000e+00> : vector<1x8x8xf32>
    %269 = tpu.matmul %266, %268, %cst_87 {dimension_numbers = #tpu.dot_dimension_numbers<[2], [1], [1], [2], [0, 0, 0, 1, 1, 2], [0], [0]>} : vector<1x8x12xbf16>, vector<1x12x8xbf16>, vector<1x8x8xf32> -> vector<1x8x8xf32>
    "tpu.trace_stop"() : () -> ()
    %270 = vector.extract_strided_slice %186 {offsets = [0, 0, 24], sizes = [1, 8, 8], strides = [1, 1, 1]} : vector<1x8x32xf32> to vector<1x8x8xf32>
    %271 = arith.truncf %270 : vector<1x8x8xf32> to vector<1x8x8xbf16>
    %272 = vector.extract_strided_slice %196 {offsets = [0, 0, 24], sizes = [1, 12, 8], strides = [1, 1, 1]} : vector<1x12x32xf32> to vector<1x12x8xf32>
    %273 = arith.truncf %272 : vector<1x12x8xf32> to vector<1x12x8xbf16>
    "tpu.trace_start"() <{level = 10 : i32, message = "bqd,bkd->bqk"}> : () -> ()
    %cst_88 = arith.constant dense<0.000000e+00> : vector<1x8x12xf32>
    %274 = tpu.matmul %271, %273, %cst_88 {dimension_numbers = #tpu.dot_dimension_numbers<[2], [2], [1], [1], [0, 0, 0, 1, 1, 1], [0], [0]>} : vector<1x8x8xbf16>, vector<1x12x8xbf16>, vector<1x8x12xf32> -> vector<1x8x12xf32>
    "tpu.trace_stop"() : () -> ()
    %275 = vector.broadcast %14 : vector<1x1x12xf32> to vector<1x8x12xf32>
    %276 = arith.addf %274, %275 : vector<1x8x12xf32>
    %cst_89 = arith.constant dense<0xFF800000> : vector<1x8xf32>
    %277 = vector.multi_reduction <maximumf>, %276, %cst_89 [2] : vector<1x8x12xf32> to vector<1x8xf32>
    %278 = vector.shape_cast %277 : vector<1x8xf32> to vector<1x8x1xf32>
    %279 = vector.broadcast %278 : vector<1x8x1xf32> to vector<1x8x12xf32>
    %280 = arith.subf %276, %279 : vector<1x8x12xf32>
    %281 = math.exp %280 : vector<1x8x12xf32>
    %cst_90 = arith.constant dense<0.000000e+00> : vector<1x8xf32>
    %282 = vector.multi_reduction <add>, %281, %cst_90 [2] : vector<1x8x12xf32> to vector<1x8xf32>
    %283 = vector.shape_cast %282 : vector<1x8xf32> to vector<1x8x1xf32>
    %284 = tpu.reciprocal %283 {approx = true} : vector<1x8x1xf32> -> vector<1x8x1xf32>
    %285 = vector.broadcast %284 : vector<1x8x1xf32> to vector<1x8x12xf32>
    %286 = arith.mulf %281, %285 : vector<1x8x12xf32>
    %287 = arith.truncf %286 : vector<1x8x12xf32> to vector<1x8x12xbf16>
    %288 = vector.extract_strided_slice %206 {offsets = [0, 0, 24], sizes = [1, 12, 8], strides = [1, 1, 1]} : vector<1x12x32xf32> to vector<1x12x8xf32>
    %289 = arith.truncf %288 : vector<1x12x8xf32> to vector<1x12x8xbf16>
    "tpu.trace_start"() <{level = 10 : i32, message = "bqk,bkd->bqd"}> : () -> ()
    %cst_91 = arith.constant dense<0.000000e+00> : vector<1x8x8xf32>
    %290 = tpu.matmul %287, %289, %cst_91 {dimension_numbers = #tpu.dot_dimension_numbers<[2], [1], [1], [2], [0, 0, 0, 1, 1, 2], [0], [0]>} : vector<1x8x12xbf16>, vector<1x12x8xbf16>, vector<1x8x8xf32> -> vector<1x8x8xf32>
    "tpu.trace_stop"() : () -> ()
    %291 = tpu.concatenate %227, %248, %269, %290 in 2 : vector<1x8x8xf32>, vector<1x8x8xf32>, vector<1x8x8xf32>, vector<1x8x8xf32> -> vector<1x8x32xf32>
    %c0_92 = arith.constant 0 : index
    %c7 = arith.constant 7 : index
    %c0_93 = arith.constant 0 : index
    %c0_94 = arith.constant 0 : index
    %292 = vector.load %arg6[%c0_92, %c7, %c0_93, %c0_94] : memref<1x8x32x32xbf16, #tpu.memory_space<vmem>>, vector<1x1x32x32xbf16>
    %293 = vector.shape_cast %292 : vector<1x1x32x32xbf16> to vector<32x32xbf16>
    %294 = vector.extract_strided_slice %16 {offsets = [7, 0], sizes = [1, 32], strides = [1, 1]} : vector<8x32xf32> to vector<1x32xf32>
    %295 = vector.shape_cast %294 : vector<1x32xf32> to vector<1x1x32xf32>
    %296 = vector.shape_cast %291 : vector<1x8x32xf32> to vector<8x32xf32>
    %297 = arith.truncf %296 : vector<8x32xf32> to vector<8x32xbf16>
    %cst_95 = arith.constant dense<0.000000e+00> : vector<8x32xf32>
    %298 = tpu.matmul %297, %293, %cst_95 {dimension_numbers = #tpu.dot_dimension_numbers<[1], [0], [0], [1], [0, 0, 1, 1], [], []>} : vector<8x32xbf16>, vector<32x32xbf16>, vector<8x32xf32> -> vector<8x32xf32>
    %299 = vector.shape_cast %298 : vector<8x32xf32> to vector<1x8x32xf32>
    %300 = vector.broadcast %295 : vector<1x1x32xf32> to vector<1x8x32xf32>
    %301 = arith.addf %299, %300 : vector<1x8x32xf32>
    %302 = arith.addf %174, %301 : vector<1x8x32xf32>
    %303 = vector.extract_strided_slice %18 {offsets = [1, 0], sizes = [1, 32], strides = [1, 1]} : vector<3x32xf32> to vector<1x32xf32>
    %304 = vector.shape_cast %303 : vector<1x32xf32> to vector<1x1x32xf32>
    %305 = vector.extract_strided_slice %20 {offsets = [1, 0], sizes = [1, 32], strides = [1, 1]} : vector<3x32xf32> to vector<1x32xf32>
    %306 = vector.shape_cast %305 : vector<1x32xf32> to vector<1x1x32xf32>
    %cst_96 = arith.constant dense<0.000000e+00> : vector<1x8xf32>
    %307 = vector.multi_reduction <add>, %302, %cst_96 [2] : vector<1x8x32xf32> to vector<1x8xf32>
    %308 = vector.shape_cast %307 : vector<1x8xf32> to vector<1x8x1xf32>
    %cst_97 = arith.constant 3.200000e+01 : f32
    %309 = vector.broadcast %cst_97 : f32 to vector<1x8x1xf32>
    %310 = arith.divf %308, %309 : vector<1x8x1xf32>
    %311 = vector.broadcast %310 : vector<1x8x1xf32> to vector<1x8x32xf32>
    %312 = arith.subf %302, %311 : vector<1x8x32xf32>
    %313 = arith.mulf %312, %312 : vector<1x8x32xf32>
    %cst_98 = arith.constant dense<0.000000e+00> : vector<1x8xf32>
    %314 = vector.multi_reduction <add>, %313, %cst_98 [2] : vector<1x8x32xf32> to vector<1x8xf32>
    %315 = vector.shape_cast %314 : vector<1x8xf32> to vector<1x8x1xf32>
    %cst_99 = arith.constant 3.200000e+01 : f32
    %316 = vector.broadcast %cst_99 : f32 to vector<1x8x1xf32>
    %317 = arith.divf %315, %316 : vector<1x8x1xf32>
    %318 = vector.broadcast %310 : vector<1x8x1xf32> to vector<1x8x32xf32>
    %319 = arith.subf %302, %318 : vector<1x8x32xf32>
    %cst_100 = arith.constant 9.99999974E-6 : f32
    %320 = vector.broadcast %cst_100 : f32 to vector<1x8x1xf32>
    %321 = arith.addf %317, %320 : vector<1x8x1xf32>
    %322 = math.rsqrt %321 : vector<1x8x1xf32>
    %323 = vector.broadcast %322 : vector<1x8x1xf32> to vector<1x8x32xf32>
    %324 = arith.mulf %319, %323 : vector<1x8x32xf32>
    %325 = vector.broadcast %304 : vector<1x1x32xf32> to vector<1x8x32xf32>
    %326 = arith.mulf %324, %325 : vector<1x8x32xf32>
    %327 = vector.broadcast %306 : vector<1x1x32xf32> to vector<1x8x32xf32>
    %328 = arith.addf %326, %327 : vector<1x8x32xf32>
    %329 = vector.shape_cast %328 : vector<1x8x32xf32> to vector<8x32xf32>
    %330 = arith.truncf %329 : vector<8x32xf32> to vector<8x32xbf16>
    %c0_101 = arith.constant 0 : index
    %c0_102 = arith.constant 0 : index
    %c0_103 = arith.constant 0 : index
    %331 = vector.load %arg8[%c0_101, %c0_102, %c0_103] : memref<1x32x64xbf16, #tpu.memory_space<vmem>>, vector<1x32x64xbf16>
    %332 = vector.shape_cast %331 : vector<1x32x64xbf16> to vector<32x64xbf16>
    %cst_104 = arith.constant dense<0.000000e+00> : vector<8x64xf32>
    %333 = tpu.matmul %330, %332, %cst_104 {dimension_numbers = #tpu.dot_dimension_numbers<[1], [0], [0], [1], [0, 0, 1, 1], [], []>} : vector<8x32xbf16>, vector<32x64xbf16>, vector<8x64xf32> -> vector<8x64xf32>
    %c0_105 = arith.constant 0 : index
    %c0_106 = arith.constant 0 : index
    %c0_107 = arith.constant 0 : index
    %334 = vector.load %arg9[%c0_105, %c0_106, %c0_107] : memref<1x1x64xf32, #tpu.memory_space<vmem>>, vector<1x1x64xf32>
    %335 = vector.shape_cast %334 : vector<1x1x64xf32> to vector<1x64xf32>
    %336 = vector.broadcast %335 : vector<1x64xf32> to vector<8x64xf32>
    %337 = arith.addf %333, %336 : vector<8x64xf32>
    %cst_108 = arith.constant 0.000000e+00 : f32
    %338 = vector.broadcast %cst_108 : f32 to vector<8x64xf32>
    %339 = arith.maximumf %337, %338 : vector<8x64xf32>
    %340 = arith.truncf %339 : vector<8x64xf32> to vector<8x64xbf16>
    %c0_109 = arith.constant 0 : index
    %c0_110 = arith.constant 0 : index
    %c0_111 = arith.constant 0 : index
    %341 = vector.load %arg10[%c0_109, %c0_110, %c0_111] : memref<1x64x32xbf16, #tpu.memory_space<vmem>>, vector<1x64x32xbf16>
    %342 = vector.shape_cast %341 : vector<1x64x32xbf16> to vector<64x32xbf16>
    %cst_112 = arith.constant dense<0.000000e+00> : vector<8x32xf32>
    %343 = tpu.matmul %340, %342, %cst_112 {dimension_numbers = #tpu.dot_dimension_numbers<[1], [0], [0], [1], [0, 0, 1, 1], [], []>} : vector<8x64xbf16>, vector<64x32xbf16>, vector<8x32xf32> -> vector<8x32xf32>
    %c0_113 = arith.constant 0 : index
    %c0_114 = arith.constant 0 : index
    %c0_115 = arith.constant 0 : index
    %344 = vector.load %arg11[%c0_113, %c0_114, %c0_115] : memref<1x1x32xf32, #tpu.memory_space<vmem>>, vector<1x1x32xf32>
    %345 = vector.shape_cast %344 : vector<1x1x32xf32> to vector<1x32xf32>
    %346 = vector.broadcast %345 : vector<1x32xf32> to vector<8x32xf32>
    %347 = arith.addf %343, %346 : vector<8x32xf32>
    %348 = vector.shape_cast %347 : vector<8x32xf32> to vector<1x8x32xf32>
    %349 = arith.addf %328, %348 : vector<1x8x32xf32>
    %350 = vector.extract_strided_slice %18 {offsets = [2, 0], sizes = [1, 32], strides = [1, 1]} : vector<3x32xf32> to vector<1x32xf32>
    %351 = vector.shape_cast %350 : vector<1x32xf32> to vector<1x1x32xf32>
    %352 = vector.extract_strided_slice %20 {offsets = [2, 0], sizes = [1, 32], strides = [1, 1]} : vector<3x32xf32> to vector<1x32xf32>
    %353 = vector.shape_cast %352 : vector<1x32xf32> to vector<1x1x32xf32>
    %cst_116 = arith.constant dense<0.000000e+00> : vector<1x8xf32>
    %354 = vector.multi_reduction <add>, %349, %cst_116 [2] : vector<1x8x32xf32> to vector<1x8xf32>
    %355 = vector.shape_cast %354 : vector<1x8xf32> to vector<1x8x1xf32>
    %cst_117 = arith.constant 3.200000e+01 : f32
    %356 = vector.broadcast %cst_117 : f32 to vector<1x8x1xf32>
    %357 = arith.divf %355, %356 : vector<1x8x1xf32>
    %358 = vector.broadcast %357 : vector<1x8x1xf32> to vector<1x8x32xf32>
    %359 = arith.subf %349, %358 : vector<1x8x32xf32>
    %360 = arith.mulf %359, %359 : vector<1x8x32xf32>
    %cst_118 = arith.constant dense<0.000000e+00> : vector<1x8xf32>
    %361 = vector.multi_reduction <add>, %360, %cst_118 [2] : vector<1x8x32xf32> to vector<1x8xf32>
    %362 = vector.shape_cast %361 : vector<1x8xf32> to vector<1x8x1xf32>
    %cst_119 = arith.constant 3.200000e+01 : f32
    %363 = vector.broadcast %cst_119 : f32 to vector<1x8x1xf32>
    %364 = arith.divf %362, %363 : vector<1x8x1xf32>
    %365 = vector.broadcast %357 : vector<1x8x1xf32> to vector<1x8x32xf32>
    %366 = arith.subf %349, %365 : vector<1x8x32xf32>
    %cst_120 = arith.constant 9.99999974E-6 : f32
    %367 = vector.broadcast %cst_120 : f32 to vector<1x8x1xf32>
    %368 = arith.addf %364, %367 : vector<1x8x1xf32>
    %369 = math.rsqrt %368 : vector<1x8x1xf32>
    %370 = vector.broadcast %369 : vector<1x8x1xf32> to vector<1x8x32xf32>
    %371 = arith.mulf %366, %370 : vector<1x8x32xf32>
    %372 = vector.broadcast %351 : vector<1x1x32xf32> to vector<1x8x32xf32>
    %373 = arith.mulf %371, %372 : vector<1x8x32xf32>
    %374 = vector.broadcast %353 : vector<1x1x32xf32> to vector<1x8x32xf32>
    %375 = arith.addf %373, %374 : vector<1x8x32xf32>
    %c0_121 = arith.constant 0 : index
    %c0_122 = arith.constant 0 : index
    %c0_123 = arith.constant 0 : index
    %376 = vector.load %arg14[%c0_121, %c0_122, %c0_123] : memref<1x8x32xf32, #tpu.memory_space<vmem>>, vector<1x8x32xf32>
    tpu.vector_store %arg14[%c0_121, %c0_122, %c0_123], %375 {strides = array<i32>} : memref<1x8x32xf32, #tpu.memory_space<vmem>>, vector<1x8x32xf32>,
    return
  }
  func.func @transform_0(%arg0: i32, %arg1: i32) -> (i32, i32, i32) {
    %c0_i32 = arith.constant 0 : i32
    %c0_i32_0 = arith.constant 0 : i32
    %c0_i32_1 = arith.constant 0 : i32
    return %arg0, %c0_i32, %c0_i32_0 : i32, i32, i32
  }
  func.func @transform_1(%arg0: i32, %arg1: i32) -> (i32, i32, i32) {
    %c0_i32 = arith.constant 0 : i32
    %c0_i32_0 = arith.constant 0 : i32
    %c0_i32_1 = arith.constant 0 : i32
    return %arg0, %c0_i32, %c0_i32_0 : i32, i32, i32
  }
  func.func @transform_2(%arg0: i32, %arg1: i32) -> (i32, i32, i32) {
    %c0_i32 = arith.constant 0 : i32
    %c0_i32_0 = arith.constant 0 : i32
    %c0_i32_1 = arith.constant 0 : i32
    return %arg0, %c0_i32, %c0_i32_0 : i32, i32, i32
  }
  func.func @transform_3(%arg0: i32, %arg1: i32) -> (i32, i32, i32) {
    %c0_i32 = arith.constant 0 : i32
    %c0_i32_0 = arith.constant 0 : i32
    %c0_i32_1 = arith.constant 0 : i32
    return %arg0, %c0_i32, %c0_i32_0 : i32, i32, i32
  }
  func.func @transform_4(%arg0: i32, %arg1: i32) -> (i32, i32, i32, i32) {
    %c0_i32 = arith.constant 0 : i32
    %c0_i32_0 = arith.constant 0 : i32
    %c0_i32_1 = arith.constant 0 : i32
    %c0_i32_2 = arith.constant 0 : i32
    return %arg1, %c0_i32, %c0_i32_0, %c0_i32_1 : i32, i32, i32, i32
  }
  func.func @transform_5(%arg0: i32, %arg1: i32) -> (i32, i32, i32) {
    %c0_i32 = arith.constant 0 : i32
    %c0_i32_0 = arith.constant 0 : i32
    %c0_i32_1 = arith.constant 0 : i32
    return %arg1, %c0_i32, %c0_i32_0 : i32, i32, i32
  }
  func.func @transform_6(%arg0: i32, %arg1: i32) -> (i32, i32, i32) {
    %c0_i32 = arith.constant 0 : i32
    %c0_i32_0 = arith.constant 0 : i32
    %c0_i32_1 = arith.constant 0 : i32
    return %arg1, %c0_i32, %c0_i32_0 : i32, i32, i32
  }
  func.func @transform_7(%arg0: i32, %arg1: i32) -> (i32, i32, i32) {
    %c0_i32 = arith.constant 0 : i32
    %c0_i32_0 = arith.constant 0 : i32
    %c0_i32_1 = arith.constant 0 : i32
    return %arg1, %c0_i32, %c0_i32_0 : i32, i32, i32
  }
  func.func @transform_8(%arg0: i32, %arg1: i32) -> (i32, i32, i32) {
    %c0_i32 = arith.constant 0 : i32
    %c0_i32_0 = arith.constant 0 : i32
    %c0_i32_1 = arith.constant 0 : i32
    return %arg1, %c0_i32, %c0_i32_0 : i32, i32, i32
  }
  func.func @transform_9(%arg0: i32, %arg1: i32) -> (i32, i32, i32) {
    %c0_i32 = arith.constant 0 : i32
    %c0_i32_0 = arith.constant 0 : i32
    %c0_i32_1 = arith.constant 0 : i32
    return %arg1, %c0_i32, %c0_i32_0 : i32, i32, i32
  }
  func.func @transform_10(%arg0: i32, %arg1: i32) -> (i32, i32, i32) {
    %c0_i32 = arith.constant 0 : i32
    %c0_i32_0 = arith.constant 0 : i32
    %c0_i32_1 = arith.constant 0 : i32
    return %arg1, %c0_i32, %c0_i32_0 : i32, i32, i32
  }
  func.func @transform_11(%arg0: i32, %arg1: i32) -> (i32, i32, i32) {
    %c0_i32 = arith.constant 0 : i32
    %c0_i32_0 = arith.constant 0 : i32
    %c0_i32_1 = arith.constant 0 : i32
    return %arg1, %c0_i32, %c0_i32_0 : i32, i32, i32
  }
  func.func @transform_12(%arg0: i32, %arg1: i32) -> (i32, i32, i32) {
    %c0_i32 = arith.constant 0 : i32
    %c0_i32_0 = arith.constant 0 : i32
    %c0_i32_1 = arith.constant 0 : i32
    return %arg0, %c0_i32, %c0_i32_0 : i32, i32, i32
  }
}

</mosaic_0001>

<bundles_post_ra>
// kernel: tpu_custom_call.1
= control target key start
LH: loop header
LB: loop body
LE: loop exit
PB: predicated region body
PF: predicated region fallthrough
CT: control target
= control target key end

     0   :  { %s3877_s0 = inlined_call_operand.vmem [shape: f32[2,8,32], index: 0, kind: input, shape index: {}]   ;;  %s3878_s1 = inlined_call_operand.vmem [shape: f32[2,1,8], index: 1, kind: input, shape index: {}]   ;;  %s3879_s2 = inlined_call_operand.vmem [shape: f32[2,12,32], index: 2, kind: input, shape index: {}]   ;;  %s3880_s3 = inlined_call_operand.vmem [shape: f32[2,1,12], index: 3, kind: input, shape index: {}]   ;;  %s3881_s4 = inlined_call_operand.hbm [shape: bf16[2,8,32,32], index: 4, kind: input, shape index: {}]   ;;  %s3882_s5 = inlined_call_operand.vmem [shape: f32[2,8,32], index: 5, kind: input, shape index: {}]   ;;  %s3883_s6 = inlined_call_operand.vmem [shape: bf16[2,32,64], index: 6, kind: input, shape index: {}]   ;;  %s3884_s7 = inlined_call_operand.vmem [shape: f32[2,1,64], index: 7, kind: input, shape index: {}]   ;;  %s3885_s8 = inlined_call_operand.vmem [shape: bf16[2,64,32], index: 8, kind: input, shape index: {}]   ;;  %s3886_s9 = inlined_call_operand.vmem [shape: f32[2,1,32], index: 9, kind: input, shape index: {}]   ;;  %s3887_s10 = inlined_call_operand.vmem [shape: f32[2,3,32], index: 10, kind: input, shape index: {}]   ;;  %s3888_s11 = inlined_call_operand.vmem [shape: f32[2,3,32], index: 11, kind: input, shape index: {}]   ;;  %s3889_s12 = inlined_call_operand.hbm [shape: f32[2,8,32], index: 12, kind: output, shape index: {}]  }
   0x1   :  { %3908 = sst [smem:[#allocation23_spill]] %s3877_s0 }
   0x2   :  { %3909 = sst [smem:[#allocation24_spill]] %s3879_s2 }
   0x3   :  { %3910 = sst [smem:[#allocation25_spill]] %s3881_s4 }
   0x4   :  { %3911 = sst [smem:[#allocation26_spill]] %s3882_s5 }
   0x5   :  { %3912 = sst [smem:[#allocation27_spill]] %s3883_s6 }
   0x6   :  { %3913 = sst [smem:[#allocation28_spill]] %s3886_s9 }
   0x7   :  { %3914 = sst [smem:[#allocation29_spill]] %s3887_s10 }
   0x8   :  { %3915 = sst [smem:[#allocation30_spill]] %s3888_s11 }
   0x9   :  { %3916 = sst [smem:[#allocation31_spill]] %s3889_s12 }
   0xa   :  { %17 = vsyncpa [#allocation3], 0 }
   0xb   :  { %19 = vsyncpa [#allocation3 + $0x1], 0 }
   0xc   :  { %20 = vsyncpa [#allocation4], 0 }
   0xd   :  { %22 = vsyncpa [#allocation4 + $0x1], 0  ;;  %s3293_s21 = smov 0   ;;  %s3295_s22 = smov 0  }
   0xe   :  { %s3297_s23 = smov 0   ;;  %s3299_s24 = smov 0  }
   0xf   :  { %s3301_s25 = smov 0   ;;  %s3303_s26 = smov 0  }
  0x10   :  { %s3305_s27 = smov 0   ;;  %s3307_s28 = smov 0  }
  0x11   :  { %s3309_s29 = smov 0   ;;  %s3311_s30 = smov 0  }
  0x12   :  { %s3313_s13 = smov 0  }
  0x13 LB: > { %3917 = sst [smem:[#allocation8_spill]] %s3174_s21  ;;  %s2539_s14 = sadd.s32 4294967295, %s3214_s13   ;;  %s3214_s13 = sphi %s3313_s13, %s28_s13   ;;  %s3210_s30 = sphi %s3311_s30, %s3968_s30   ;;  %s3206_s29 = sphi %s3309_s29, %s3967_s29   ;;  %s3202_s28 = sphi %s3307_s28, %s3966_s28   ;;  %s3198_s27 = sphi %s3305_s27, %s3965_s27   ;;  %s3194_s26 = sphi %s3303_s26, %s3964_s26   ;;  %s3190_s25 = sphi %s3301_s25, %s3963_s25   ;;  %s3186_s24 = sphi %s3299_s24, %s3962_s24   ;;  %s3182_s23 = sphi %s3297_s23, %s3961_s23   ;;  %s3178_s22 = sphi %s3295_s22, %s3960_s22   ;;  %s3174_s21 = sphi %s3293_s21, %s3959_s21  }
  0x14   : > { %3918 = sst [smem:[#allocation9_spill]] %s3178_s22  ;;  %s2540_s15 = sadd.s32 4294967294, %s3214_s13  }
  0x15   : > { %3919 = sst [smem:[#allocation10_spill]] %s3182_s23  ;;  %s37_s16 = sadd.s32 1, %s3206_s29 }
  0x16   : > { %3920 = sst [smem:[#allocation11_spill]] %s3190_s25  ;;  %s40_s17 = sadd.s32 1, %s3210_s30 }
  0x17   : > { %3921 = sst [smem:[#allocation12_spill]] %s3194_s26  ;;  %p38_p0 = scmp.ge.s32.totalorder %s37_s16, 2 }
  0x18   : > { %3922 = sst [smem:[#allocation13_spill]] %s3202_s28  ;;  %s151_s18 = sadd.s32 1, %s3194_s26 }
  0x19   : > { %3923 = sst [smem:[#allocation14_spill]] %s3206_s29  ;;  %p158_p1 = scmp.ne.s32.totalorder %s3194_s26, %s3190_s25 }
  0x1a   : > { %3924 = sst [smem:[#allocation15_spill]] %s3210_s30  ;;  %p159_p2 = scmp.eq.s32.totalorder %s3214_s13, 0 }
  0x1b   : > { %3925 = sst [smem:[#allocation16_spill]] %s3214_s13  ;;  %s3970_s16 = smov (%p38_p0, %s37_s16), 0 }
  0x1c   : > { %3926 = sst [smem:[#allocation17_spill]] %s3970_s16  ;;  %s3972_s17 = smov (!%p38_p0, %s40_s17), %s3210_s30 }
  0x1d   : > { %s148_s19 = ssub.s32 %s3206_s29, %s3970_s16  ;;  %p3359_p3 = por %p159_p2, %p158_p1 }
  0x1e   : > { %p42_p4 = scmp.ge.s32.totalorder %s3972_s17, 2  ;;  %p149_p5 = scmp.eq.s32.totalorder %s148_s19, 0 }
  0x1f   : > { %p164_p6 = scmp.ne.s32.totalorder %s3190_s25, %s3186_s24  ;;  %p165_p7 = scmp.eq.s32.totalorder %s2539_s14, 0 }
  0x20   : > { %s3974_s17 = smov (%p42_p4, %s3972_s17), 0  ;;  %s359_s10 = sadd.s32 1, %s3182_s23 }
  0x21   : > { %3928 = sst [smem:[#allocation18_spill]] %s3974_s17  ;;  %p3369_p8 = por %p165_p7, %p164_p6 }
  0x22   : > { %s3367_s12 = scalar_select %p149_p5, %s3194_s26, %s151_s18  }
  0x23   : > { %s356_s11 = ssub.s32 %s3210_s30, %s3974_s17  ;;  %p369_p10 = scmp.ne.s32.totalorder %s3182_s23, %s3178_s22 }
  0x24   : > { %3929 = sst [smem:[#allocation19_spill]] %s3367_s12  ;;  %p357_p9 = scmp.eq.s32.totalorder %s356_s11, 0 }
  0x25   : > { %p370_p11 = scmp.eq.s32.totalorder %s2539_s14, 3  ;;  %p375_p13 = scmp.ne.s32.totalorder %s3178_s22, %s3174_s21 }
  0x26   : > { %s3379_s19 = scalar_select %p357_p9, %s3182_s23, %s359_s10  }
  0x27   : > { %p3381_p12 = por %p370_p11, %p369_p10  ;;  %p376_p0 = scmp.eq.s32.totalorder %s2540_s15, 3 }
  0x28   : > { %3931 = sst [smem:[#allocation20_spill]] %s3379_s19  ;;  %p2902_p1 = scmp.lt.s32.totalorder %s3214_s13, 4 }
  0x29   : > { %s3932_s24 = scalar_select %p3381_p12, 1, 0 }
  0x2a   : > { %s423_s18 = sand.u32 1, %s3194_s26   ;;  %p3389_p2 = por %p376_p0, %p375_p13 }
  0x2b   : > { %3933 = sst [smem:[#allocation21_spill]] %s3932_s24  ;;  %s2543_s17 = sshll.u32 %s423_s18, 7 }
  0x2c   : > { %s3934_s12 = scalar_select %p3389_p2, 1, 0 }
  0x2d   : > { %s2642_s11 = sshll.u32 %s3206_s29, 11  ;;  %s3936_s4 = sld [smem:[#allocation25_spill]] }
  0x2e   : > { %3935 = sst [smem:[#allocation22_spill]] %s3934_s12  ;;  %s427_s10 = scalar_lea.vmem [#allocation2], %s2543_s17 }
  0x2f   : > { %s434_s19 = sshll.u32 %s427_s10, 4  ;;  %p3401_p4 = pnand %p2902_p1, %p3359_p3  ;;  %s3405_s19 = int_to_ptr.vmem [resolvable:$true] %s434_s19 }
  0x30   : > { %s3407_s29 = scalar_lea.sflag [#allocation3], %s423_s18 }
  0x31   : > { %p3064_p6 = pneg %p3401_p4 }
  0x33   : > { %s3397_s14 = scalar_lea.hbm %s3936_s4, %s2642_s11  ;;  %s3067_s20 = scalar_lea.hbm %s3936_s4, 4096 }
  0x34   : > { %s3062_s9 = scalar_lea.hbm %s3397_s14, 2048  ;;  %p3068_p3 = scmp.lt.u32.totalorder %s3397_s14, %s3936_s4 }
  0x35   : > { %p3063_p5 = scmp.ne.s32.totalorder %s3397_s14, %s3062_s9  ;;  %p3069_p10 = scmp.lt.u32.totalorder %s3067_s20, %s3062_s9 }
  0x36   : > { %p3071_p13 = scmp.lt.u32.totalorder %s3062_s9, %s3397_s14 }
  0x37   : > { %p3065_p7 = pnand %p3064_p6, %p3063_p5  ;;  %p3070_p11 = por %p3069_p10, %p3068_p3 }
  0x39   : > { %p3066_p9 = pneg %p3065_p7  ;;  %p3072_p0 = por %p3071_p13, %p3070_p11 }
  0x3b   : > { %p3073_p1 = pnand %p3072_p0, %p3066_p9 }
  0x3d   : > { %3076 = shalt.err (!%p3073_p1)
}
  0x3e   : > { %s3077_s18 = scalar_lea.vmem %s3405_s19, 2048  ;;  %s3216_s30 = smov [#allocation2]  }
  0x3f   : > { %p3078_p5 = scmp.ne.s32.totalorder %s3405_s19, %s3077_s18  ;;  %s3082_s17 = sshll.u32 %s3216_s30, 4  ;;  %s3083_s17 = int_to_ptr.vmem [resolvable:$false] %s3082_s17 }
  0x40   : > { %s3084_s11 = scalar_lea.vmem %s3083_s17, 4096  ;;  %p3085_p12 = scmp.lt.s32.totalorder %s3405_s19, %s3083_s17 }
  0x41   : > { %p3080_p7 = pnand %p3078_p5, %p3064_p6  ;;  %p3086_p3 = scmp.lt.s32.totalorder %s3084_s11, %s3077_s18 }
  0x43   : > { %p3081_p2 = pneg %p3080_p7  ;;  %p3087_p10 = por %p3086_p3, %p3085_p12 }
  0x45   : > { %p3088_p11 = pnand %p3087_p10, %p3081_p2 }
  0x47   : > { %3091 = shalt.err (!%p3088_p11)
}
  0x48   : > { %s3217_s9 = smov 64   ;;  %s3218_s20 = smov 4  }
  0x49   : > { %2897 = dma.hbm_to_vmem [thread:$0]  (!%p3401_p4), %s3397_s14, 2048, %s3405_s19, %s3407_s29, %s3217_s9, %s3217_s9, %s3218_s20  }
  0x4a   : > { %p2546_p6 = scmp.ge.s32.totalorder %s3214_s13, 1  ;;  %p491_p9 = scmp.lt.s32.totalorder %s3214_s13, 5 }
  0x4c   : > { %p492_p13 = pnand %p2546_p6, %p491_p9 }
  0x4d   : > { %s497_s10 = sand.u32 (!%p492_p13), 1, %s3190_s25  }
  0x4e   : > { %495 = sbr.rel (%p492_p13) target bundleno = 4363 (0x110b), region = 68  ;;  %s2547_s18 = sshll.u32 (!%p492_p13), %s497_s10, 7 }
  0x4f   : > { %s498_s30 = scalar_lea.sflag (!%p492_p13), [#allocation3], %s497_s10  ;;  %s3438_s17 = scalar_lea.vmem (!%p492_p13), [#allocation2], %s2547_s18 }
  0x55   : > { %3165 = dma.done.wait (%p3369_p8), %s498_s30, 2048  }
  0x56   : > { %3167 = vsyncadd (%p3369_p8), %s498_s30, 4294965248  ;;  %s3896_s29 = sand.u32 1, %s3178_s22   ;;  %p585_p12 = scmp.lt.s32.totalorder %s3202_s28, 1 }
  0x57   : > { %s2548_s19 = sshll.u32 %s3896_s29, 3  ;;  %p600_p2 = scmp.lt.s32.totalorder %s3198_s27, 1 }
  0x58   : > { %s3450_s14 = scalar_select %p585_p12, %s3202_s28, 1 }
  0x59   : > { %s3453_s15 = scalar_select %p600_p2, %s3198_s27, 1 }
  0x5a   : > { %s2549_s16 = sshll.u32 %s3450_s14, 3  ;;  %s3938_s0 = sld [smem:[#allocation23_spill]] }
  0x5b   : > { %s2643_s29 = sshll.u32 %s3450_s14, 4  ;;  %s3939_s2 = sld [smem:[#allocation24_spill]] }
  0x5c   : > { %s2552_s13 = sshll.u32 %s3453_s15, 3  ;;  %s2644_s24 = sshll.u32 %s3453_s15, 4 }
  0x5d   : > { %s3940_s5 = sld [smem:[#allocation26_spill]]  ;;  %s3941_s6 = sld [smem:[#allocation27_spill]] }
  0x5e   : > { %s3942_s22 = sld [smem:[#allocation28_spill]]  ;;  %s3943_s9 = sld [smem:[#allocation29_spill]] }
  0x5f   : > { %s3944_s18 = sld [smem:[#allocation30_spill]]  ;;  %s3510_s26 = scalar_lea.vmem [#allocation5], %s2548_s19 }
  0x60   : > { %s588_s30 = scalar_lea.vmem %s3938_s0, %s2549_s16  ;;  %p2559_p8 = scmp.ne.s32.totalorder %s3198_s27, 0 }
  0x61   : > { %s3467_s25 = scalar_lea.vmem %s3939_s2, %s2643_s29  ;;  %s2645_s29 = sshll.u32 %s3453_s15, 5  ;;  %v633_v0 = vld [vmem:[%s588_s30] sm:$0xff] (!%p2559_p8)  ;;  %vm634_vm0 = vcmask (!%p2559_p8), 261120  }
  0x62   : > { %s3493_s23 = scalar_lea.vmem %s3885_s8, %s2645_s29  ;;  %632 = sbr.rel (%p2559_p8) target bundleno = 105 (0x69), region = 76  ;;  %635 = vst.msk [vmem:[%s3510_s26] sm:$0xff] (!%p2559_p8), %vm634_vm0, %v633_v0 }
  0x63   : > { %s3478_s11 = scalar_lea.vmem %s3940_s5, %s2552_s13  ;;  %s3483_s16 = scalar_lea.vmem %s3941_s6, %s2644_s24 }
  0x64   : > { %s619_s28 = scalar_lea.vmem %s3942_s22, %s3453_s15  ;;  %s2557_s13 = sshll.u32 %s3453_s15, 2 }
  0x65   : > { %s3503_s24 = scalar_lea.vmem %s3943_s9, %s2557_s13  ;;  %s3508_s4 = scalar_lea.vmem %s3944_s18, %s2557_s13 }
  0x69 PF: > { %v3002_v1 = vld [vmem:[%s3438_s17 + $0x10] sm:$0xff]   ;;  %v3219_v2 = vmov 0.0   ;;  %v3003_v3 = vld [vmem:[%s3438_s17] sm:$0xff]   ;;  %v3004_v4 = vld [vmem:[%s3438_s17 + $0x18] sm:$0xff]   ;;  %vm3220_vm1 = vmmov 0   ;;  %vm665_vm2 = vcmask 261120   ;;  %v709_v8 = vlaneseq  ;;  %s3945_s27 = scalar_lea.vmem %s3878_s1, %s3450_s14  ;;  %s3946_s29 = scalar_lea.vmem %s3880_s3, %s3450_s14 }
  0x6a   : > { %2718 = vmatprep.subr.bf16.mxu1 %v3219_v2  ;;  %2710 = vmatprep.subr.bf16.mxu0 %v3219_v2  ;;  %v3005_v5 = vld [vmem:[%s3438_s17 + $0x8] sm:$0xff]   ;;  %v3545_v11 = vld [vmem:[%s3478_s11] sm:$0xff]  ;;  %vm847_vm3 = vcmask 64512   ;;  %s3221_s0 = smov 112   ;;  %s3222_s2 = smov 120   ;;  %vm910_vm4 = vcmask 1043456  }
  0x6b   : > { %2719 = vmatpush3.bf16.msra.mxu1 %v3002_v1  ;;  %2722 = vmatprep.mubr.msk.bf16.mxu1 %vm3220_vm1, %v3219_v2  ;;  %v3525_v6 = vld [vmem:[%s3510_s26] sm:$0xff]  ;;  %v3539_v9 = vshrl.u32 %v709_v8, 7  ;;  %s3223_s5 = smov 104   ;;  %s3224_s19 = smov 8   ;;  %vm1300_vm5 = vcmask 130048   ;;  %vm1302_vm6 = vcmask 195584  }
  0x6c   : > { %2711 = vmatpush3.bf16.msra.mxu0 %v3003_v3  ;;  %2720 = vmatprep.subr.bf16.mxu1 %v3219_v2  ;;  %v652_v7 = vpack.c.bf16 %v3525_v6, %v3525_v6  ;;  %v3006_v29 = vld [vmem:[%s3438_s17 + $0x20] sm:$0xff]   ;;  %v3007_v30 = vld [vmem:[%s3438_s17 + $0x28] sm:$0xff]   ;;  %s3225_s20 = smov 16   ;;  %s3226_s30 = smov 24   ;;  %vm1648_vm7 = vcmask 97280   ;;  %vm1665_vm8 = vcmask 1045504  }
  0x6d   : > { %2712 = vmatprep.subr.bf16.mxu0 %v3219_v2  ;;  %2714 = vmatprep.mubr.msk.bf16.mxu0 %vm3220_vm1, %v3219_v2  ;;  %v3542_v10 = vsub.s32 1, %v3539_v9  ;;  %v3548_v12 = vsub.s32 0, %v3539_v9  ;;  %v639_v40 = vld [vmem:[%s3945_s27] sm:$0x1]  ;;  %v3595_v50 = vsub.s32 2, %v3539_v9  ;;  %vm2255_vm9 = vcmask 523264  }
  0x6e   : > { %v640_v41 = vsub.f32 1.0, %v639_v40  ;;  %s3227_s21 = smov [#allocation5]  }
  0x6f   : > { %2721 = vmatpush3.bf16.msra.mxu1 %v3004_v4  ;;  %v775_v13 = vrot.slane %v3545_v11, %v3542_v10  ;;  %v712_v14 = vrot.slane %v3545_v11, %v3548_v12  ;;  %v837_v51 = vrot.slane %v3545_v11, %v3595_v50  ;;  %s3096_s27 = sshll.u32 %s3227_s21, 4  ;;  %s3097_s27 = int_to_ptr.vmem [resolvable:$false] %s3096_s27 }
  0x70   : > { %2713 = vmatpush3.bf16.msra.mxu0 %v3005_v5  ;;  %2734 = vmatprep.subr.bf16.mxu1 %v3219_v2  ;;  %v641_v42 = vmul.f32 -1e+09, %v640_v41 }
  0x71   : > { %2726 = vmatprep.subr.bf16.mxu0 %v3219_v2 }
  0x72   : > { %2723 = vmatmul.mubr.msk.bf16.vlgmr.msra.gmra.mrb[0].mxu1 %vm665_vm2, %v652_v7  ;;  %v845_v43 = vrot.slane %v641_v42, %v3548_v12 }
  0x73   : > { %2715 = vmatmul.mubr.msk.bf16.vlgmr.msra.gmra.mrb[0].mxu0 %vm665_vm2, %v652_v7  ;;  %2736 = vmatprep.mubr.msk.bf16.mxu1 %vm3220_vm1, %v3219_v2 }
  0x74   : > { %2730 = vmatprep.mubr.msk.bf16.mxu0 %vm3220_vm1, %v3219_v2  ;;  %2727 = vmatpush3.bf16.msra.mxu0 %v3006_v29 }
  0x75   : > { %2728 = vmatprep.subr.bf16.mxu0 %v3219_v2 }
  0x78   : > { %2729 = vmatpush3.bf16.msra.mxu0 %v3007_v30 }
  0x79   : > { %2740 = vmatprep.subr.bf16.mxu0 %v3219_v2 }
  0x7b   : > { %2731 = vmatmul.mubr.msk.bf16.vlgmr.msra.gmra.mrb[4].mxu0 %vm665_vm2, %v652_v7 }
  0x7c   : > { %2742 = vmatprep.mubr.msk.bf16.mxu0 %vm3220_vm1, %v3219_v2 }
 0x145   : > { %v766_v15 = vpop.f32.mrb[0].mxu1 }
 0x146   : > { %v776_v16 = vadd.f32 %v775_v13, %v766_v15  ;;  %v2724_v17 = vpop.f32.mrb[1].mxu1  ;;  %v703_v18 = vpop.f32.mrb[0].mxu0 }
 0x147   : > { %v713_v19 = vadd.f32 %v712_v14, %v703_v18  ;;  %v769_v20 = vpop.f32.mrb[2].mxu1  ;;  %v2716_v21 = vpop.f32.mrb[1].mxu0 }
 0x148   : > { %v840_v22 = vpack.c.bf16 %v776_v16, %v776_v16  ;;  %v2725_v23 = vpop.f32.mrb[3].mxu1  ;;  %v706_v24 = vpop.f32.mrb[2].mxu0 }
 0x149   : > { %v714_v25 = vmul.f32 0.35355338, %v713_v19  ;;  %v2717_v26 = vpop.f32.mrb[3].mxu0 }
 0x14a   : > { %1069 = vrot.lane.b32.xlu1 %v840_v22, %s3221_s0  ;;  %958 = vrot.lane.b32.xlu0 %v840_v22, %s3222_s2  ;;  %v852_v27 = vsel %vm847_vm3, %v840_v22, 0 }
 0x14b   : > { %v839_v28 = vpack.c.bf16 %v714_v25, %v714_v25  ;;  %2735 = vmatpush3.bf16.xpose.msra.mxu1 %v852_v27 }
 0x14c   : > { %2746 = vmatprep.subr.bf16.mxu1 %v3219_v2 }
 0x14e   : > { %1067 = vrot.lane.b32.xlu1 %v839_v28, %s3221_s0  ;;  %955 = vrot.lane.b32.xlu0 %v839_v28, %s3222_s2  ;;  %v828_v52 = vpop.f32.mrb[4].mxu0 }
 0x14f   : > { %v838_v53 = vadd.f32 %v837_v51, %v828_v52  ;;  %v2732_v54 = vpop.f32.mrb[5].mxu0 }
 0x150   : > { %v831_v55 = vpop.f32.mrb[6].mxu0 }
 0x151   : > { %v906_v56 = vpack.c.bf16 %v838_v53, %v838_v53  ;;  %v2733_v57 = vpop.f32.mrb[7].mxu0 }
 0x152   : > { %1177 = vrot.lane.b32.xlu1 %v839_v28, %s3223_s5  ;;  %1179 = vrot.lane.b32.xlu0 %v840_v22, %s3223_s5 }
 0x153   : > { %2737 = vmatmul.mubr.msk.bf16.vlgmr.msra.gmra.mrb[4].mxu1 %vm847_vm3, %v839_v28  ;;  %v912_v58 = vsel %vm910_vm4, %v906_v56, 0 }
 0x154   : > { %2748 = vmatprep.mubr.msk.bf16.mxu1 %vm3220_vm1, %v3219_v2  ;;  %2741 = vmatpush3.bf16.msra.mxu0 %v912_v58 }
 0x155   : > { %2752 = vmatprep.subr.bf16.mxu0 %v3219_v2 }
 0x1bc   : > { %v959_v31 = vpop.permute.xlu0 %958  ;;  %v1070_v33 = vpop.permute.xlu1 %1069 }
 0x1bd   : > { %v964_v32 = vsel %vm847_vm3, %v959_v31, 0  ;;  %v1075_v35 = vsel %vm847_vm3, %v1070_v33, 0 }
 0x1be   : > { %2747 = vmatpush3.bf16.xpose.msra.mxu1 %v964_v32 }
 0x1bf   : > { %2758 = vmatprep.subr.bf16.mxu1 %v3219_v2 }
 0x1c0   : > { %v956_v34 = vpop.permute.xlu0 %955  ;;  %v1068_v37 = vpop.permute.xlu1 %1067 }
 0x1c4   : > { %v1180_v36 = vpop.permute.xlu0 %1179  ;;  %v1178_v39 = vpop.permute.xlu1 %1177 }
 0x1c5   : > { %2749 = vmatmul.mubr.msk.bf16.vlgmr.msra.gmra.mrb[8].mxu1 %vm847_vm3, %v956_v34  ;;  %v1185_v38 = vsel %vm847_vm3, %v1180_v36, 0 }
 0x1c6   : > { %2759 = vmatpush3.bf16.xpose.msra.mxu1 %v1075_v35  ;;  %2760 = vmatprep.mubr.msk.bf16.mxu1 %vm3220_vm1, %v3219_v2 }
 0x1c7   : > { %2770 = vmatprep.subr.bf16.mxu1 %v3219_v2 }
 0x1cd   : > { %2761 = vmatmul.mubr.msk.bf16.vlgmr.msra.gmra.mrb[12].mxu1 %vm847_vm3, %v1068_v37 }
 0x1ce   : > { %2771 = vmatpush3.bf16.xpose.msra.mxu1 %v1185_v38  ;;  %2772 = vmatprep.mubr.msk.bf16.mxu1 %vm3220_vm1, %v3219_v2 }
 0x1cf   : > { %2782 = vmatprep.subr.bf16.mxu1 %v3219_v2 }
 0x1d5   : > { %2773 = vmatmul.mubr.msk.bf16.vlgmr.msra.gmra.mrb[16].mxu1 %vm847_vm3, %v1178_v39 }
 0x1d6   : > { %2786 = vmatprep.mubr.msk.bf16.mxu1 %vm3220_vm1, %v3219_v2 }
 0x226   : > { %v888_v44 = vpop.f32.mrb[4].mxu1 }
 0x227   : > { %v889_v45 = vadd.f32 %v888_v44, %v845_v43  ;;  %v2738_v46 = vpop.f32.mrb[5].mxu1 }
 0x228   : > { %v891_v47 = vpop.f32.mrb[6].mxu1 }
 0x229   : > { %v2739_v48 = vpop.f32.mrb[7].mxu1  ;;  %v894_v49 = vsel %vm847_vm3, %v889_v45, -inf }
 0x22a   : > { %895 = vmax.xlane.f32.xlu0 %v894_v49 }
 0x298   : > { %v1000_v59 = vpop.f32.mrb[8].mxu1 }
 0x299   : > { %v1001_v60 = vadd.f32 %v1000_v59, %v845_v43  ;;  %v2750_v61 = vpop.f32.mrb[9].mxu1 }
 0x29a   : > { %v1003_v62 = vpop.f32.mrb[10].mxu1 }
 0x29b   : > { %v2751_v63 = vpop.f32.mrb[11].mxu1  ;;  %v1006_v0 = vsel %vm847_vm3, %v1001_v60, -inf }
 0x29c   : > { %1007 = vmax.xlane.f32.xlu1 %v1006_v0 }
 0x2a0   : > { %v1111_v1 = vpop.f32.mrb[12].mxu1 }
 0x2a1   : > { %v1112_v3 = vadd.f32 %v1111_v1, %v845_v43  ;;  %v2762_v4 = vpop.f32.mrb[13].mxu1 }
 0x2a2   : > { %v1114_v5 = vpop.f32.mrb[14].mxu1 }
 0x2a3   : > { %v2763_v7 = vpop.f32.mrb[15].mxu1  ;;  %v1117_v8 = vsel %vm847_vm3, %v1112_v3, -inf }
 0x2a4   : > { %1118 = vmax.xlane.f32.xlu0 %v1117_v8 }
 0x2a8   : > { %v1221_v13 = vpop.f32.mrb[16].mxu1 }
 0x2a9   : > { %v1222_v14 = vadd.f32 %v1221_v13, %v845_v43  ;;  %v2774_v15 = vpop.f32.mrb[17].mxu1  ;;  %v3009_v13 = vld [vmem:[%s3438_s17 + $0x38] sm:$0xff]  }
 0x2aa   : > { %v1224_v16 = vpop.f32.mrb[18].mxu1 }
 0x2ab   : > { %v2775_v17 = vpop.f32.mrb[19].mxu1  ;;  %v1227_v18 = vsel %vm847_vm3, %v1222_v14, -inf }
 0x2ac   : > { %1228 = vmax.xlane.f32.xlu0 %v1227_v18 }
 0x2b7   : > { %v896_v19 = vpop.xlane.xlu0 %895 }
 0x2b8   : > { %v897_v20 = vsub.f32 %v889_v45, %v896_v19 }
 0x2ba   : > { %v898_v21 = vmul.f32 1.442695, %v897_v20 }
 0x2bc   : > { %3024 = vpow2.f32 %v898_v21 }
 0x2c6   : > { %v3025_v22 = vpop.eup %3024 }
 0x2c7   : > { %v900_v23 = vsel %vm847_vm3, %v3025_v22, 0.0 }
 0x2c8   : > { %901 = vadd.xlane.f32.xlu1 %v900_v23 }
 0x2d9   : > { %1019 = vrot.lane.b32.xlu1 %v906_v56, %s3222_s2 }
 0x329   : > { %v1008_v24 = vpop.xlane.xlu1 %1007 }
 0x32a   : > { %v1009_v25 = vsub.f32 %v1001_v60, %v1008_v24 }
 0x32c   : > { %v1010_v26 = vmul.f32 1.442695, %v1009_v25 }
 0x32e   : > { %3026 = vpow2.f32 %v1010_v26 }
 0x331   : > { %v1119_v27 = vpop.xlane.xlu0 %1118 }
 0x332   : > { %v1120_v28 = vsub.f32 %v1112_v3, %v1119_v27  ;;  %v3008_v3 = vld [vmem:[%s3438_s17 + $0x30] sm:$0xff]  }
 0x333   : > { %2783 = vmatpush3.bf16.msra.mxu1 %v3008_v3 }
 0x334   : > { %v1121_v29 = vmul.f32 1.442695, %v1120_v28  ;;  %2784 = vmatprep.subr.bf16.mxu1 %v3219_v2 }
 0x336   : > { %3028 = vpow2.f32 %v1121_v29  ;;  %v1367_v29 = vsub.s32 3, %v3539_v9 }
 0x337   : > { %2785 = vmatpush3.bf16.msra.mxu1 %v3009_v13 }
 0x338   : > { %v3027_v30 = vpop.eup %3026  ;;  %2798 = vmatprep.subr.bf16.mxu1 %v3219_v2 }
 0x339   : > { %v1229_v31 = vpop.xlane.xlu0 %1228  ;;  %v1012_v32 = vsel %vm847_vm3, %v3027_v30, 0.0 }
 0x33a   : > { %v1230_v33 = vsub.f32 %v1222_v14, %v1229_v31  ;;  %1013 = vadd.xlane.f32.xlu0 %v1012_v32 }
 0x33c   : > { %v1231_v34 = vmul.f32 1.442695, %v1230_v33 }
 0x33e   : > { %3030 = vpow2.f32 %v1231_v34 }
 0x340   : > { %v3029_v35 = vpop.eup %3028 }
 0x341   : > { %v1123_v36 = vsel %vm847_vm3, %v3029_v35, 0.0 }
 0x342   : > { %1124 = vadd.xlane.f32.xlu1 %v1123_v36 }
 0x348   : > { %v3031_v37 = vpop.eup %3030 }
 0x349   : > { %v1233_v38 = vsel %vm847_vm3, %v3031_v37, 0.0 }
 0x34a   : > { %1234 = vadd.xlane.f32.xlu0 %v1233_v38  ;;  %v3010_v38 = vld [vmem:[%s3438_s17 + $0x50] sm:$0xff]  }
 0x353   : > { %1239 = vrot.lane.b32.xlu1 %v906_v56, %s3223_s5 }
 0x355   : > { %v902_v39 = vpop.xlane.xlu1 %901 }
 0x356   : > { %3032 = vrcp.f32 %v902_v39 }
 0x359   : > { %v1020_v41 = vpop.permute.xlu1 %1019 }
 0x35a   : > { %v1025_v44 = vsel %vm910_vm4, %v1020_v41, 0 }
 0x360   : > { %v3033_v40 = vpop.eup %3032  ;;  %1129 = vrot.lane.b32.xlu0 %v906_v56, %s3221_s0 }
 0x361   : > { %v904_v42 = vmul.f32 %v3033_v40, %v3025_v22 }
 0x363   : > { %v905_v43 = vpack.c.bf16 %v904_v42, %v904_v42 }
 0x365   : > { %2743 = vmatmul.mubr.msk.bf16.vlgmr.msra.gmra.mrb[8].mxu0 %vm847_vm3, %v905_v43 }
 0x366   : > { %2753 = vmatpush3.bf16.msra.mxu0 %v1025_v44  ;;  %2754 = vmatprep.mubr.msk.bf16.mxu0 %vm3220_vm1, %v3219_v2  ;;  %v3011_v44 = vld [vmem:[%s3438_s17 + $0x58] sm:$0xff]  }
 0x367   : > { %2764 = vmatprep.subr.bf16.mxu0 %v3219_v2 }
 0x3c7   : > { %v1014_v45 = vpop.xlane.xlu0 %1013 }
 0x3c8   : > { %3034 = vrcp.f32 %v1014_v45  ;;  %v637_v45 = vld [vmem:[%s3467_s25] sm:$0xff] }
 0x3cf   : > { %v1125_v46 = vpop.xlane.xlu1 %1124 }
 0x3d0   : > { %3036 = vrcp.f32 %v1125_v46 }
 0x3d2   : > { %v3035_v47 = vpop.eup %3034 }
 0x3d3   : > { %v1016_v48 = vmul.f32 %v3035_v47, %v3027_v30  ;;  %v1240_v56 = vpop.permute.xlu1 %1239  ;;  %v1368_v30 = vrot.slane %v3545_v11, %v1367_v29  ;;  %v3012_v47 = vld [vmem:[%s3438_s17 + $0x40] sm:$0xff]  }
 0x3d4   : > { %v1245_v58 = vsel %vm910_vm4, %v1240_v56, 0 }
 0x3d5   : > { %v1017_v49 = vpack.c.bf16 %v1016_v48, %v1016_v48  ;;  %v3013_v48 = vld [vmem:[%s3438_s17 + $0x48] sm:$0xff]  }
 0x3d7   : > { %v1235_v51 = vpop.xlane.xlu0 %1234  ;;  %2755 = vmatmul.mubr.msk.bf16.vlgmr.msra.gmra.mrb[12].mxu0 %vm847_vm3, %v1017_v49 }
 0x3d8   : > { %3038 = vrcp.f32 %v1235_v51  ;;  %2766 = vmatprep.mubr.msk.bf16.mxu0 %vm3220_vm1, %v3219_v2 }
 0x3da   : > { %v3037_v52 = vpop.eup %3036 }
 0x3db   : > { %v1127_v53 = vmul.f32 %v3037_v52, %v3029_v35  ;;  %v1130_v54 = vpop.permute.xlu0 %1129 }
 0x3dc   : > { %v1135_v55 = vsel %vm910_vm4, %v1130_v54, 0  ;;  %v3667_v54 = vld [vmem:[%s3508_s4] sm:$0x7]  ;;  %s3952_s4 = sld [smem:[#allocation31_spill]] }
 0x3dd   : > { %2765 = vmatpush3.bf16.msra.mxu0 %v1135_v55  ;;  %v1128_v57 = vpack.c.bf16 %v1127_v53, %v1127_v53  ;;  %v3664_v53 = vld [vmem:[%s3503_s24] sm:$0x7]  ;;  %s2338_s24 = sshll.u32 %s3510_s26, 4  ;;  %s3813_s24 = int_to_ptr.vmem [resolvable:$true] %s2338_s24 }
 0x3de   : > { %2776 = vmatprep.subr.bf16.mxu0 %v3219_v2  ;;  %v1388_v55 = vrot.slane %v3664_v53, %v3548_v12  ;;  %s3092_s6 = scalar_lea.vmem %s3813_s24, 128  ;;  %p3099_p7 = scmp.lt.s32.totalorder %s3813_s24, %s3097_s27 }
 0x3df   : > { %p3093_p4 = scmp.ne.s32.totalorder %s3813_s24, %s3092_s6 }
 0x3e0   : > { %2767 = vmatmul.mubr.msk.bf16.vlgmr.msra.gmra.mrb[16].mxu0 %vm847_vm3, %v1128_v57 }
 0x3e1   : > { %2777 = vmatpush3.bf16.msra.mxu0 %v1245_v58  ;;  %2778 = vmatprep.mubr.msk.bf16.mxu0 %vm3220_vm1, %v3219_v2  ;;  %v1393_v58 = vrot.slane %v3667_v54, %v3548_v12 }
 0x3e2   : > { %v3039_v59 = vpop.eup %3038  ;;  %2790 = vmatprep.subr.bf16.mxu0 %v3219_v2 }
 0x3e3   : > { %v1237_v60 = vmul.f32 %v3039_v59, %v3031_v37 }
 0x3e5   : > { %v1238_v61 = vpack.c.bf16 %v1237_v60, %v1237_v60 }
 0x3e8   : > { %2779 = vmatmul.mubr.msk.bf16.vlgmr.msra.gmra.mrb[20].mxu0 %vm847_vm3, %v1238_v61 }
 0x3e9   : > { %2794 = vmatprep.mubr.msk.bf16.mxu0 %vm3220_vm1, %v3219_v2  ;;  %2791 = vmatpush3.bf16.msra.mxu0 %v3012_v47 }
 0x3ea   : > { %2792 = vmatprep.subr.bf16.mxu0 %v3219_v2 }
 0x3ed   : > { %2793 = vmatpush3.bf16.msra.mxu0 %v3013_v48 }
 0x3ee   : > { %2806 = vmatprep.subr.bf16.mxu0 %v3219_v2 }
 0x438   : > { %v948_v62 = vpop.f32.mrb[8].mxu0 }
 0x439   : > { %v2744_v63 = vpop.f32.mrb[9].mxu0 }
 0x43a   : > { %v951_v0 = vpop.f32.mrb[10].mxu0 }
 0x43b   : > { %v2745_v1 = vpop.f32.mrb[11].mxu0 }
 0x4aa   : > { %v1061_v4 = vpop.f32.mrb[12].mxu0 }
 0x4ab   : > { %1288 = vrot.lane.b32.xlu1 %v1061_v4, %s3224_s19  ;;  %v2756_v5 = vpop.f32.mrb[13].mxu0 }
 0x4ac   : > { %v1064_v7 = vpop.f32.mrb[14].mxu0 }
 0x4ad   : > { %v2757_v8 = vpop.f32.mrb[15].mxu0 }
 0x4b3   : > { %v1171_v14 = vpop.f32.mrb[16].mxu0 }
 0x4b4   : > { %1292 = vrot.lane.b32.xlu0 %v1171_v14, %s3225_s20  ;;  %v2768_v15 = vpop.f32.mrb[17].mxu0  ;;  %v1458_v14 = vsub.s32 4, %v3539_v9 }
 0x4b5   : > { %v1174_v16 = vpop.f32.mrb[18].mxu0 }
 0x4b6   : > { %v2769_v17 = vpop.f32.mrb[19].mxu0  ;;  %v1459_v15 = vrot.slane %v3545_v11, %v1458_v14 }
 0x4bb   : > { %v1281_v18 = vpop.f32.mrb[20].mxu0 }
 0x4bc   : > { %1296 = vrot.lane.b32.xlu1 %v1281_v18, %s3226_s30  ;;  %v2780_v19 = vpop.f32.mrb[21].mxu0 }
 0x4bd   : > { %v1284_v20 = vpop.f32.mrb[22].mxu0 }
 0x4be   : > { %v2781_v21 = vpop.f32.mrb[23].mxu0 }
 0x51d   : > { %v1289_v22 = vpop.permute.xlu1 %1288 }
 0x51e   : > { %v1299_v24 = vsel %vm847_vm3, %v948_v62, %v1289_v22  ;;  %v1526_v62 = vsub.s32 5, %v3539_v9 }
 0x520   : > { %v1527_v63 = vrot.slane %v3545_v11, %v1526_v62 }
 0x526   : > { %v1293_v23 = vpop.permute.xlu0 %1292 }
 0x527   : > { %v1301_v25 = vsel %vm1300_vm5, %v1299_v24, %v1293_v23 }
 0x52e   : > { %v1297_v26 = vpop.permute.xlu1 %1296 }
 0x52f   : > { %v1303_v27 = vsel %vm1302_vm6, %v1301_v25, %v1297_v26  ;;  %v3014_v25 = vld [vmem:[%s3438_s17 + $0x60] sm:$0xff]   ;;  %v3015_v26 = vld [vmem:[%s3438_s17 + $0x68] sm:$0xff]  }
 0x530   : > { %v1309_v28 = vpack.c.bf16 %v1303_v27, %v1303_v27 }
 0x532   : > { %2787 = vmatmul.mubr.msk.bf16.vlgmr.msra.gmra.mrb[20].mxu1 %vm665_vm2, %v1309_v28 }
 0x533   : > { %2802 = vmatprep.mubr.msk.bf16.mxu1 %vm3220_vm1, %v3219_v2  ;;  %2799 = vmatpush3.bf16.msra.mxu1 %v3010_v38 }
 0x534   : > { %2800 = vmatprep.subr.bf16.mxu1 %v3219_v2 }
 0x537   : > { %2801 = vmatpush3.bf16.msra.mxu1 %v3011_v44  ;;  %v1590_v44 = vsub.s32 6, %v3539_v9 }
 0x538   : > { %2814 = vmatprep.subr.bf16.mxu1 %v3219_v2 }
 0x605   : > { %v1359_v31 = vpop.f32.mrb[20].mxu1 }
 0x606   : > { %v1369_v32 = vadd.f32 %v1368_v30, %v1359_v31  ;;  %v2788_v33 = vpop.f32.mrb[21].mxu1 }
 0x607   : > { %v1362_v34 = vpop.f32.mrb[22].mxu1 }
 0x608   : > { %v2789_v35 = vpop.f32.mrb[23].mxu1  ;;  %v1370_v36 = vadd.f32 %v1369_v32, %v3525_v6  ;;  %v638_v6 = vld [vmem:[%s3467_s25 + $0x8] sm:$0xf]  ;;  %v642_v34 = vld [vmem:[%s3946_s29] sm:$0x1] }
 0x609   : > { %v3652_v46 = vpack.c.bf16 %v638_v6, %v637_v45  ;;  %v643_v35 = vsub.f32 1.0, %v642_v34  ;;  %v1591_v45 = vrot.slane %v3545_v11, %v1590_v44 }
 0x60a   : > { %v1371_v37 = vsel %vm665_vm2, %v1370_v36, 0.0 }
 0x60b   : > { %1372 = vadd.xlane.f32.xlu0 %v1371_v37  ;;  %2803 = vmatmul.mubr.msk.bf16.vlgmr.msra.gmra.mrb[24].mxu1 %vm665_vm2, %v3652_v46 }
 0x60c   : > { %2816 = vmatprep.mubr.msk.bf16.mxu1 %vm3220_vm1, %v3219_v2 }
 0x698   : > { %v1373_v39 = vpop.xlane.xlu0 %1372 }
 0x699   : > { %v1375_v40 = vmul.f32 0.03125, %v1373_v39 }
 0x69b   : > { %v1376_v41 = vsub.f32 %v1370_v36, %v1375_v40  ;;  %v644_v36 = vmul.f32 -1e+09, %v643_v35 }
 0x69d   : > { %v1377_v42 = vmul.f32 %v1376_v41, %v1376_v41  ;;  %v1600_v37 = vrot.slane %v644_v36, %v3548_v12 }
 0x69f   : > { %v1378_v43 = vsel %vm665_vm2, %v1377_v42, 0.0 }
 0x6a0   : > { %1379 = vadd.xlane.f32.xlu1 %v1378_v43 }
 0x6de   : > { %v1517_v0 = vpop.f32.mrb[24].mxu1 }
 0x6df   : > { %v1528_v1 = vadd.f32 %v1527_v63, %v1517_v0  ;;  %v2804_v3 = vpop.f32.mrb[25].mxu1 }
 0x6e0   : > { %v1520_v4 = vpop.f32.mrb[26].mxu1 }
 0x6e1   : > { %v1529_v5 = vadd.f32 %v1527_v63, %v1520_v4  ;;  %v2805_v7 = vpop.f32.mrb[27].mxu1 }
 0x6e3   : > { %v1595_v8 = vpack.c.bf16 %v1529_v5, %v1528_v1 }
 0x6e5   : > { %1713 = vrot.lane.b32.xlu0 %v1595_v8, %s3222_s2  ;;  %v1606_v13 = vsel %vm847_vm3, %v1595_v8, 0 }
 0x6e6   : > { %2815 = vmatpush3.bf16.xpose.msra.mxu1 %v1606_v13 }
 0x6e7   : > { %2826 = vmatprep.subr.bf16.mxu1 %v3219_v2 }
 0x6e9   : > { %1824 = vrot.lane.b32.xlu0 %v1595_v8, %s3221_s0 }
 0x6ed   : > { %1934 = vrot.lane.b32.xlu0 %v1595_v8, %s3223_s5 }
 0x72d   : > { %v1380_v49 = vpop.xlane.xlu1 %1379 }
 0x72e   : > { %v1381_v51 = vmul.f32 0.03125, %v1380_v49 }
 0x730   : > { %v1382_v52 = vadd.f32 1e-05, %v1381_v51 }
 0x732   : > { %3040 = vrsqrt.f32 %v1382_v52 }
 0x73c   : > { %v3041_v56 = vpop.eup %3040 }
 0x73d   : > { %v1384_v57 = vmul.f32 %v3041_v56, %v1376_v41 }
 0x73f   : > { %v1389_v59 = vmul.f32 %v1388_v55, %v1384_v57 }
 0x741   : > { %v3673_v60 = vadd.f32 %v1393_v58, %v1389_v59 }
 0x743   : > { %v1400_v61 = vpack.c.bf16 %v3673_v60, %v3673_v60 }
 0x745   : > { %2795 = vmatmul.mubr.msk.bf16.vlgmr.msra.gmra.mrb[24].mxu0 %vm665_vm2, %v1400_v61 }
 0x746   : > { %2810 = vmatprep.mubr.msk.bf16.mxu0 %vm3220_vm1, %v3219_v2  ;;  %2807 = vmatpush3.bf16.msra.mxu0 %v3014_v25 }
 0x747   : > { %2808 = vmatprep.subr.bf16.mxu0 %v3219_v2 }
 0x74a   : > { %2809 = vmatpush3.bf16.msra.mxu0 %v3015_v26 }
 0x74b   : > { %2820 = vmatprep.subr.bf16.mxu0 %v3219_v2 }
 0x74d   : > { %2811 = vmatmul.mubr.msk.bf16.vlgmr.msra.gmra.mrb[28].mxu0 %vm665_vm2, %v3652_v46 }
 0x74e   : > { %2822 = vmatprep.mubr.msk.bf16.mxu0 %vm3220_vm1, %v3219_v2 }
 0x757   : > { %v1714_v22 = vpop.permute.xlu0 %1713 }
 0x758   : > { %v1719_v24 = vsel %vm847_vm3, %v1714_v22, 0 }
 0x75b   : > { %v1825_v27 = vpop.permute.xlu0 %1824 }
 0x75c   : > { %v1830_v29 = vsel %vm847_vm3, %v1825_v27, 0 }
 0x75f   : > { %v1935_v30 = vpop.permute.xlu0 %1934 }
 0x760   : > { %v1940_v32 = vsel %vm847_vm3, %v1935_v30, 0 }
 0x818   : > { %v1450_v16 = vpop.f32.mrb[24].mxu0 }
 0x819   : > { %v1460_v17 = vadd.f32 %v1459_v15, %v1450_v16  ;;  %v2796_v18 = vpop.f32.mrb[25].mxu0 }
 0x81a   : > { %v1453_v19 = vpop.f32.mrb[26].mxu0 }
 0x81b   : > { %v1461_v20 = vmul.f32 0.35355338, %v1460_v17  ;;  %v2797_v21 = vpop.f32.mrb[27].mxu0 }
 0x81d   : > { %v1594_v23 = vpack.c.bf16 %v1461_v20, %v1461_v20 }
 0x81f   : > { %1710 = vrot.lane.b32.xlu1 %v1594_v23, %s3222_s2  ;;  %2817 = vmatmul.mubr.msk.bf16.vlgmr.msra.gmra.mrb[28].mxu1 %vm847_vm3, %v1594_v23 }
 0x820   : > { %2827 = vmatpush3.bf16.xpose.msra.mxu1 %v1719_v24  ;;  %2828 = vmatprep.mubr.msk.bf16.mxu1 %vm3220_vm1, %v3219_v2  ;;  %v1581_v6 = vpop.f32.mrb[28].mxu0 }
 0x821   : > { %2838 = vmatprep.subr.bf16.mxu1 %v3219_v2  ;;  %v1592_v46 = vadd.f32 %v1591_v45, %v1581_v6  ;;  %v2812_v47 = vpop.f32.mrb[29].mxu0 }
 0x822   : > { %v1584_v48 = vpop.f32.mrb[30].mxu0 }
 0x823   : > { %1822 = vrot.lane.b32.xlu1 %v1594_v23, %s3221_s0  ;;  %v1593_v49 = vadd.f32 %v1591_v45, %v1584_v48  ;;  %v2813_v51 = vpop.f32.mrb[31].mxu0 }
 0x825   : > { %v1661_v12 = vpack.c.bf16 %v1593_v49, %v1592_v46 }
 0x827   : > { %1932 = vrot.lane.b32.xlu1 %v1594_v23, %s3223_s5  ;;  %v1667_v52 = vsel %vm1665_vm8, %v1661_v12, 0 }
 0x828   : > { %2821 = vmatpush3.bf16.msra.mxu0 %v1667_v52 }
 0x829   : > { %2832 = vmatprep.subr.bf16.mxu0 %v3219_v2 }
 0x891   : > { %v1711_v28 = vpop.permute.xlu1 %1710 }
 0x892   : > { %2829 = vmatmul.mubr.msk.bf16.vlgmr.msra.gmra.mrb[32].mxu1 %vm847_vm3, %v1711_v28 }
 0x893   : > { %2839 = vmatpush3.bf16.xpose.msra.mxu1 %v1830_v29  ;;  %2840 = vmatprep.mubr.msk.bf16.mxu1 %vm3220_vm1, %v3219_v2 }
 0x894   : > { %2850 = vmatprep.subr.bf16.mxu1 %v3219_v2 }
 0x895   : > { %v1823_v31 = vpop.permute.xlu1 %1822 }
 0x899   : > { %v1933_v33 = vpop.permute.xlu1 %1932 }
 0x89a   : > { %2841 = vmatmul.mubr.msk.bf16.vlgmr.msra.gmra.mrb[36].mxu1 %vm847_vm3, %v1823_v31 }
 0x89b   : > { %2851 = vmatpush3.bf16.xpose.msra.mxu1 %v1940_v32  ;;  %2852 = vmatprep.mubr.msk.bf16.mxu1 %vm3220_vm1, %v3219_v2 }
 0x89c   : > { %2862 = vmatprep.subr.bf16.mxu1 %v3219_v2 }
 0x8a2   : > { %2853 = vmatmul.mubr.msk.bf16.vlgmr.msra.gmra.mrb[40].mxu1 %vm847_vm3, %v1933_v33 }
 0x8a3   : > { %2866 = vmatprep.mubr.msk.bf16.mxu1 %vm3220_vm1, %v3219_v2 }
 0x8f2   : > { %v1642_v38 = vpop.f32.mrb[28].mxu1 }
 0x8f3   : > { %v1643_v39 = vadd.f32 %v1642_v38, %v1600_v37  ;;  %v2818_v40 = vpop.f32.mrb[29].mxu1 }
 0x8f4   : > { %v1645_v41 = vpop.f32.mrb[30].mxu1 }
 0x8f5   : > { %v2819_v42 = vpop.f32.mrb[31].mxu1  ;;  %v1649_v43 = vsel %vm1648_vm7, %v1643_v39, -inf }
 0x8f6   : > { %1650 = vmax.xlane.f32.xlu0 %v1649_v43 }
 0x965   : > { %v1755_v55 = vpop.f32.mrb[32].mxu1 }
 0x966   : > { %v1756_v56 = vadd.f32 %v1755_v55, %v1600_v37  ;;  %v2830_v57 = vpop.f32.mrb[33].mxu1 }
 0x967   : > { %v1758_v58 = vpop.f32.mrb[34].mxu1 }
 0x968   : > { %v2831_v59 = vpop.f32.mrb[35].mxu1  ;;  %v1761_v61 = vsel %vm1648_vm7, %v1756_v56, -inf }
 0x969   : > { %1762 = vmax.xlane.f32.xlu1 %v1761_v61 }
 0x96d   : > { %v1866_v62 = vpop.f32.mrb[36].mxu1 }
 0x96e   : > { %v1867_v63 = vadd.f32 %v1866_v62, %v1600_v37  ;;  %v2842_v0 = vpop.f32.mrb[37].mxu1 }
 0x96f   : > { %v1869_v1 = vpop.f32.mrb[38].mxu1  ;;  %v3016_v0 = vld [vmem:[%s3438_s17 + $0x70] sm:$0xff]  }
 0x970   : > { %v2843_v3 = vpop.f32.mrb[39].mxu1  ;;  %v1872_v4 = vsel %vm1648_vm7, %v1867_v63, -inf  ;;  %2863 = vmatpush3.bf16.msra.mxu1 %v3016_v0 }
 0x971   : > { %1873 = vmax.xlane.f32.xlu0 %v1872_v4  ;;  %2864 = vmatprep.subr.bf16.mxu1 %v3219_v2 }
 0x975   : > { %v1976_v5 = vpop.f32.mrb[40].mxu1 }
 0x976   : > { %v1977_v7 = vadd.f32 %v1976_v5, %v1600_v37  ;;  %v2854_v8 = vpop.f32.mrb[41].mxu1 }
 0x977   : > { %v1979_v13 = vpop.f32.mrb[42].mxu1 }
 0x978   : > { %v2855_v14 = vpop.f32.mrb[43].mxu1  ;;  %v1982_v15 = vsel %vm1648_vm7, %v1977_v7, -inf }
 0x979   : > { %1983 = vmax.xlane.f32.xlu0 %v1982_v15 }
 0x983   : > { %v1651_v16 = vpop.xlane.xlu0 %1650 }
 0x984   : > { %v1652_v17 = vsub.f32 %v1643_v39, %v1651_v16 }
 0x986   : > { %v1653_v18 = vmul.f32 1.442695, %v1652_v17 }
 0x988   : > { %3042 = vpow2.f32 %v1653_v18 }
 0x992   : > { %v3043_v19 = vpop.eup %3042 }
 0x993   : > { %v1655_v20 = vsel %vm1648_vm7, %v3043_v19, 0.0 }
 0x994   : > { %1656 = vadd.xlane.f32.xlu1 %v1655_v20 }
 0x9a5   : > { %1774 = vrot.lane.b32.xlu1 %v1661_v12, %s3222_s2 }
 0x9f6   : > { %v1763_v21 = vpop.xlane.xlu1 %1762 }
 0x9f7   : > { %v1764_v22 = vsub.f32 %v1756_v56, %v1763_v21 }
 0x9f9   : > { %v1765_v23 = vmul.f32 1.442695, %v1764_v22 }
 0x9fb   : > { %3044 = vpow2.f32 %v1765_v23 }
 0x9fe   : > { %v1874_v24 = vpop.xlane.xlu0 %1873 }
 0x9ff   : > { %v1875_v25 = vsub.f32 %v1867_v63, %v1874_v24 }
 0xa01   : > { %v1876_v26 = vmul.f32 1.442695, %v1875_v25 }
 0xa03   : > { %3046 = vpow2.f32 %v1876_v26 }
 0xa05   : > { %v3045_v27 = vpop.eup %3044 }
 0xa06   : > { %v1984_v28 = vpop.xlane.xlu0 %1983  ;;  %v1767_v29 = vsel %vm1648_vm7, %v3045_v27, 0.0 }
 0xa07   : > { %v1985_v30 = vsub.f32 %v1977_v7, %v1984_v28  ;;  %1768 = vadd.xlane.f32.xlu0 %v1767_v29  ;;  %v3017_v7 = vld [vmem:[%s3438_s17 + $0x78] sm:$0xff]  }
 0xa08   : > { %2865 = vmatpush3.bf16.msra.mxu1 %v3017_v7 }
 0xa09   : > { %v1986_v31 = vmul.f32 1.442695, %v1985_v30  ;;  %2878 = vmatprep.subr.bf16.mxu1 %v3219_v2 }
 0xa0b   : > { %3048 = vpow2.f32 %v1986_v31 }
 0xa0d   : > { %v3047_v32 = vpop.eup %3046 }
 0xa0e   : > { %v1878_v33 = vsel %vm1648_vm7, %v3047_v32, 0.0 }
 0xa0f   : > { %1879 = vadd.xlane.f32.xlu1 %v1878_v33 }
 0xa15   : > { %v3049_v34 = vpop.eup %3048 }
 0xa16   : > { %v1988_v35 = vsel %vm1648_vm7, %v3049_v34, 0.0 }
 0xa17   : > { %1989 = vadd.xlane.f32.xlu0 %v1988_v35 }
 0xa20   : > { %1994 = vrot.lane.b32.xlu1 %v1661_v12, %s3223_s5 }
 0xa21   : > { %v1657_v36 = vpop.xlane.xlu1 %1656 }
 0xa22   : > { %3050 = vrcp.f32 %v1657_v36 }
 0xa25   : > { %v1775_v38 = vpop.permute.xlu1 %1774 }
 0xa26   : > { %v1780_v41 = vsel %vm1665_vm8, %v1775_v38, 0 }
 0xa2c   : > { %v3051_v37 = vpop.eup %3050 }
 0xa2d   : > { %v1659_v39 = vmul.f32 %v3051_v37, %v3043_v19  ;;  %1884 = vrot.lane.b32.xlu0 %v1661_v12, %s3221_s0 }
 0xa2f   : > { %v1660_v40 = vpack.c.bf16 %v1659_v39, %v1659_v39 }
 0xa31   : > { %2823 = vmatmul.mubr.msk.bf16.vlgmr.msra.gmra.mrb[32].mxu0 %vm1648_vm7, %v1660_v40  ;;  %v3019_v40 = vld [vmem:[%s3483_s16 + $0x8] sm:$0xff]  }
 0xa32   : > { %2833 = vmatpush3.bf16.msra.mxu0 %v1780_v41  ;;  %2834 = vmatprep.mubr.msk.bf16.mxu0 %vm3220_vm1, %v3219_v2  ;;  %v3020_v41 = vld [vmem:[%s3493_s23] sm:$0xff]  }
 0xa33   : > { %2844 = vmatprep.subr.bf16.mxu0 %v3219_v2 }
 0xa94   : > { %v1769_v42 = vpop.xlane.xlu0 %1768 }
 0xa95   : > { %3052 = vrcp.f32 %v1769_v42 }
 0xa9c   : > { %v1880_v43 = vpop.xlane.xlu1 %1879 }
 0xa9d   : > { %3054 = vrcp.f32 %v1880_v43 }
 0xa9f   : > { %v3053_v44 = vpop.eup %3052 }
 0xaa0   : > { %v1771_v45 = vmul.f32 %v3053_v44, %v3045_v27  ;;  %v1995_v12 = vpop.permute.xlu1 %1994  ;;  %v2120_v27 = vsub.s32 7, %v3539_v9 }
 0xaa1   : > { %v2000_v55 = vsel %vm1665_vm8, %v1995_v12, 0  ;;  %v3022_v12 = vld [vmem:[%s3493_s23 + $0x10] sm:$0xff]  }
 0xaa2   : > { %v1772_v6 = vpack.c.bf16 %v1771_v45, %v1771_v45  ;;  %v2121_v28 = vrot.slane %v3545_v11, %v2120_v27  ;;  %v3018_v11 = vld [vmem:[%s3483_s16] sm:$0xff]   ;;  %v2140_v45 = vrot.slane %v3664_v53, %v3542_v10  ;;  %s3947_s16 = scalar_lea.vmem %s3884_s7, %s3453_s15  ;;  %s3950_s15 = sld [smem:[#allocation9_spill]] }
 0xaa4   : > { %v1990_v46 = vpop.xlane.xlu0 %1989  ;;  %2835 = vmatmul.mubr.msk.bf16.vlgmr.msra.gmra.mrb[36].mxu0 %vm1648_vm7, %v1772_v6 }
 0xaa5   : > { %3056 = vrcp.f32 %v1990_v46  ;;  %2846 = vmatprep.mubr.msk.bf16.mxu0 %vm3220_vm1, %v3219_v2  ;;  %v2145_v46 = vrot.slane %v3667_v54, %v3542_v10 }
 0xaa7   : > { %v3055_v47 = vpop.eup %3054 }
 0xaa8   : > { %v1882_v48 = vmul.f32 %v3055_v47, %v3047_v32  ;;  %v1885_v49 = vpop.permute.xlu0 %1884  ;;  %s3953_s2 = sand.u32 1, %s3950_s15  }
 0xaa9   : > { %v1890_v51 = vsel %vm1665_vm8, %v1885_v49, 0  ;;  %s2325_s5 = scalar_lea.sflag [#allocation4], %s3953_s2 }
 0xaaa   : > { %2845 = vmatpush3.bf16.msra.mxu0 %v1890_v51  ;;  %v1883_v52 = vpack.c.bf16 %v1882_v48, %v1882_v48 }
 0xaab   : > { %2856 = vmatprep.subr.bf16.mxu0 %v3219_v2 }
 0xaad   : > { %2847 = vmatmul.mubr.msk.bf16.vlgmr.msra.gmra.mrb[40].mxu0 %vm1648_vm7, %v1883_v52  ;;  %v3023_v52 = vld [vmem:[%s3493_s23 + $0x18] sm:$0xff]  }
 0xaae   : > { %2857 = vmatpush3.bf16.msra.mxu0 %v2000_v55  ;;  %2858 = vmatprep.mubr.msk.bf16.mxu0 %vm3220_vm1, %v3219_v2  ;;  %v2628_v55 = vld [vmem:[%s3947_s16] ss:$0 sm:$0xff] }
 0xaaf   : > { %v3057_v56 = vpop.eup %3056  ;;  %2870 = vmatprep.subr.bf16.mxu0 %v3219_v2 }
 0xab0   : > { %v1992_v57 = vmul.f32 %v3057_v56, %v3049_v34 }
 0xab2   : > { %v1993_v58 = vpack.c.bf16 %v1992_v57, %v1992_v57 }
 0xab5   : > { %2859 = vmatmul.mubr.msk.bf16.vlgmr.msra.gmra.mrb[44].mxu0 %vm1648_vm7, %v1993_v58 }
 0xab6   : > { %2874 = vmatprep.mubr.msk.bf16.mxu0 %vm3220_vm1, %v3219_v2  ;;  %2871 = vmatpush3.bf16.msra.mxu0 %v3018_v11 }
 0xab7   : > { %2872 = vmatprep.subr.bf16.mxu0 %v3219_v2 }
 0xaba   : > { %2873 = vmatpush3.bf16.msra.mxu0 %v3019_v40 }
 0xb04   : > { %v1703_v59 = vpop.f32.mrb[32].mxu0 }
 0xb05   : > { %v2824_v61 = vpop.f32.mrb[33].mxu0 }
 0xb06   : > { %v1706_v62 = vpop.f32.mrb[34].mxu0 }
 0xb07   : > { %v2825_v63 = vpop.f32.mrb[35].mxu0 }
 0xb77   : > { %v1816_v1 = vpop.f32.mrb[36].mxu0 }
 0xb78   : > { %2043 = vrot.lane.b32.xlu1 %v1816_v1, %s3224_s19  ;;  %v2836_v3 = vpop.f32.mrb[37].mxu0  ;;  %s3098_s19 = scalar_lea.vmem %s3097_s27, 256 }
 0xb79   : > { %v1819_v4 = vpop.f32.mrb[38].mxu0  ;;  %p3100_p3 = scmp.lt.s32.totalorder %s3098_s19, %s3092_s6 }
 0xb7a   : > { %v2837_v5 = vpop.f32.mrb[39].mxu0 }
 0xb7b   : > { %p3101_p10 = por %p3100_p3, %p3099_p7 }
 0xb80   : > { %v1926_v8 = vpop.f32.mrb[40].mxu0 }
 0xb81   : > { %2047 = vrot.lane.b32.xlu0 %v1926_v8, %s3225_s20  ;;  %v2848_v13 = vpop.f32.mrb[41].mxu0 }
 0xb82   : > { %v1929_v14 = vpop.f32.mrb[42].mxu0 }
 0xb83   : > { %v2849_v15 = vpop.f32.mrb[43].mxu0 }
 0xb88   : > { %v2036_v16 = vpop.f32.mrb[44].mxu0 }
 0xb89   : > { %2051 = vrot.lane.b32.xlu1 %v2036_v16, %s3226_s30  ;;  %v2860_v17 = vpop.f32.mrb[45].mxu0 }
 0xb8a   : > { %v2039_v18 = vpop.f32.mrb[46].mxu0 }
 0xb8b   : > { %v2861_v19 = vpop.f32.mrb[47].mxu0 }
 0xbea   : > { %v2044_v20 = vpop.permute.xlu1 %2043 }
 0xbeb   : > { %v2054_v22 = vsel %vm847_vm3, %v1703_v59, %v2044_v20  ;;  %v2316_v20 = vrot.slane %v3664_v53, %v3595_v50 }
 0xbf3   : > { %v2048_v21 = vpop.permute.xlu0 %2047 }
 0xbf4   : > { %v2055_v23 = vsel %vm1300_vm5, %v2054_v22, %v2048_v21 }
 0xbfb   : > { %v2052_v24 = vpop.permute.xlu1 %2051 }
 0xbfc   : > { %v2056_v25 = vsel %vm1302_vm6, %v2055_v23, %v2052_v24  ;;  %v2321_v23 = vrot.slane %v3667_v54, %v3595_v50 }
 0xbfd   : > { %v2062_v26 = vpack.c.bf16 %v2056_v25, %v2056_v25 }
 0xbff   : > { %2867 = vmatmul.mubr.msk.bf16.vlgmr.msra.gmra.mrb[44].mxu1 %vm665_vm2, %v2062_v26 }
 0xc00   : > { %2886 = vmatprep.mubr.msk.bf16.mxu1 %vm3220_vm1, %v3219_v2  ;;  %2879 = vmatpush3.bf16.msra.mxu1 %v3020_v41 }
 0xc01   : > { %2880 = vmatprep.subr.bf16.mxu1 %v3219_v2 }
 0xcd2   : > { %v2112_v29 = vpop.f32.mrb[44].mxu1 }
 0xcd3   : > { %v2122_v30 = vadd.f32 %v2121_v28, %v2112_v29  ;;  %v2868_v31 = vpop.f32.mrb[45].mxu1 }
 0xcd4   : > { %v2115_v32 = vpop.f32.mrb[46].mxu1 }
 0xcd5   : > { %v2869_v33 = vpop.f32.mrb[47].mxu1  ;;  %v2123_v34 = vadd.f32 %v2122_v30, %v3673_v60  ;;  %v3021_v60 = vld [vmem:[%s3493_s23 + $0x8] sm:$0xff]   ;;  %s3949_s23 = sld [smem:[#allocation13_spill]] }
 0xcd6   : > { %2881 = vmatpush3.bf16.msra.mxu1 %v3021_v60 }
 0xcd7   : > { %v2124_v35 = vsel %vm665_vm2, %v2123_v34, 0.0  ;;  %2882 = vmatprep.subr.bf16.mxu1 %v3219_v2 }
 0xcd8   : > { %2125 = vadd.xlane.f32.xlu0 %v2124_v35 }
 0xcda   : > { %2883 = vmatpush3.bf16.msra.mxu1 %v3022_v12 }
 0xcdb   : > { %2884 = vmatprep.subr.bf16.mxu1 %v3219_v2  ;;  %v2632_v2 = vld [vmem:[%s619_s28] ss:$0 sm:$0xff]  ;;  %s3951_s28 = sld [smem:[#allocation21_spill]]  ;;  %s2639_s9 = sshll.u32 %s3949_s23, 7 }
 0xcdc   : > { %s3811_s0 = scalar_lea.hbm %s3952_s4, %s2639_s9 }
 0xcde   : > { %2885 = vmatpush3.bf16.msra.mxu1 %v3023_v52 }
 0xce1   : > { %p3954_p0 = scmp.ne.s32.totalorder %s3951_s28, 0 }
 0xce3   : > { %p3094_p1 = pnand %p3093_p4, %p3954_p0 }
 0xce5   : > { %p3095_p5 = pneg %p3094_p1 }
 0xce7   : > { %p3102_p11 = pnand %p3101_p10, %p3095_p5 }
 0xd65   : > { %v2126_v36 = vpop.xlane.xlu0 %2125 }
 0xd66   : > { %v2127_v37 = vmul.f32 0.03125, %v2126_v36 }
 0xd68   : > { %v2128_v38 = vsub.f32 %v2123_v34, %v2127_v37 }
 0xd6a   : > { %v2129_v9 = vmul.f32 %v2128_v38, %v2128_v38 }
 0xd6c   : > { %v2130_v39 = vsel %vm665_vm2, %v2129_v9, 0.0 }
 0xd6d   : > { %2131 = vadd.xlane.f32.xlu1 %v2130_v39 }
 0xdfa   : > { %v2132_v42 = vpop.xlane.xlu1 %2131 }
 0xdfb   : > { %v2133_v43 = vmul.f32 0.03125, %v2132_v42 }
 0xdfd   : > { %v2134_v44 = vadd.f32 1e-05, %v2133_v43 }
 0xdff   : > { %3058 = vrsqrt.f32 %v2134_v44 }
 0xe09   : > { %v3059_v6 = vpop.eup %3058 }
 0xe0a   : > { %v2136_v47 = vmul.f32 %v3059_v6, %v2128_v38 }
 0xe0c   : > { %v2141_v48 = vmul.f32 %v2140_v45, %v2136_v47 }
 0xe0e   : > { %v2146_v49 = vadd.f32 %v2145_v46, %v2141_v48 }
 0xe10   : > { %v2147_v51 = vpack.c.bf16 %v2146_v49, %v2146_v49 }
 0xe12   : > { %2875 = vmatmul.mubr.msk.bf16.vlgmr.msra.gmra.mrb[48].mxu0 %vm665_vm2, %v2147_v51 }
 0xee5   : > { %v2208_v56 = vpop.f32.mrb[48].mxu0 }
 0xee6   : > { %v2209_v10 = vadd.f32 %v2628_v55, %v2208_v56  ;;  %v2876_v57 = vpop.f32.mrb[49].mxu0 }
 0xee7   : > { %v2211_v58 = vpop.f32.mrb[50].mxu0 }
 0xee8   : > { %v2214_v59 = vmax.f32 %v2209_v10, 0.0  ;;  %v2877_v61 = vpop.f32.mrb[51].mxu0 }
 0xeea   : > { %v2215_v62 = vpack.c.bf16 %v2214_v59, %v2214_v59 }
 0xeec   : > { %2887 = vmatmul.mubr.msk.bf16.vlgmr.msra.gmra.mrb[48].mxu1 %vm2255_vm9, %v2215_v62 }
 0xfbf   : > { %v2293_v63 = vpop.f32.mrb[48].mxu1 }
 0xfc0   : > { %v2294_v0 = vadd.f32 %v2632_v2, %v2293_v63  ;;  %v2888_v1 = vpop.f32.mrb[49].mxu1 }
 0xfc1   : > { %v2296_v3 = vpop.f32.mrb[50].mxu1 }
 0xfc2   : > { %v2889_v4 = vpop.f32.mrb[51].mxu1  ;;  %v2299_v5 = vadd.f32 %v2294_v0, %v2146_v49 }
 0xfc4   : > { %v2300_v7 = vsel %vm665_vm2, %v2299_v5, 0.0 }
 0xfc5   : > { %2301 = vadd.xlane.f32.xlu0 %v2300_v7 }
0x1052   : > { %v2302_v8 = vpop.xlane.xlu0 %2301 }
0x1053   : > { %v2303_v13 = vmul.f32 0.03125, %v2302_v8 }
0x1055   : > { %v2304_v14 = vsub.f32 %v2299_v5, %v2303_v13 }
0x1057   : > { %v2305_v15 = vmul.f32 %v2304_v14, %v2304_v14 }
0x1059   : > { %v2306_v16 = vsel %vm665_vm2, %v2305_v15, 0.0 }
0x105a   : > { %2307 = vadd.xlane.f32.xlu0 %v2306_v16 }
0x10e7   : > { %v2308_v17 = vpop.xlane.xlu0 %2307 }
0x10e8   : > { %v2309_v18 = vmul.f32 0.03125, %v2308_v17 }
0x10ea   : > { %v2310_v19 = vadd.f32 1e-05, %v2309_v18 }
0x10ec   : > { %3060 = vrsqrt.f32 %v2310_v19 }
0x10f6   : > { %v3061_v21 = vpop.eup %3060 }
0x10f7   : > { %v2312_v22 = vmul.f32 %v3061_v21, %v2304_v14 }
0x10f9   : > { %v2317_v24 = vmul.f32 %v2316_v20, %v2312_v22 }
0x10fb   : > { %v2322_v25 = vadd.f32 %v2321_v23, %v2317_v24 }
0x10fd   : > { %2323 = vst.msk [vmem:[%s3510_s26] sm:$0xff] %vm665_vm2, %v2322_v25 }
0x10fe   : > { %3105 = shalt.err (!%p3102_p11)
}
0x10ff   : > { %s3106_s26 = scalar_lea.hbm %s3811_s0, 128  ;;  %s3110_s25 = scalar_lea.hbm %s3952_s4, 256 }
0x1100   : > { %p3107_p6 = scmp.ne.s32.totalorder %s3811_s0, %s3106_s26  ;;  %p3111_p12 = scmp.lt.u32.totalorder %s3811_s0, %s3952_s4 }
0x1101   : > { %p3112_p2 = scmp.lt.u32.totalorder %s3110_s25, %s3106_s26  ;;  %p3114_p4 = scmp.lt.u32.totalorder %s3106_s26, %s3811_s0 }
0x1102   : > { %p3108_p9 = pnand %p3107_p6, %p3954_p0 }
0x1103   : > { %p3113_p8 = por %p3112_p2, %p3111_p12 }
0x1104   : > { %p3109_p13 = pneg %p3108_p9 }
0x1105   : > { %p3115_p1 = por %p3114_p4, %p3113_p8 }
0x1107   : > { %p3116_p5 = pnand %p3115_p1, %p3109_p13 }
0x1109   : > { %3119 = shalt.err (!%p3116_p5)
}
0x110a   : > { %2892 = dma.vmem_to_hbm [thread:$0]  (%p3954_p0), %s3813_s24, 128, %s3811_s0, %s2325_s5  }
0x110b PF: > { %s3955_s17 = sld [smem:[#allocation16_spill]]  ;;  %s3956_s14 = sld [smem:[#allocation8_spill]] }
0x110c   : > { %s3957_s16 = sld [smem:[#allocation22_spill]] }
0x1111   : > { %p2903_p7 = scmp.ge.s32.totalorder %s3955_s17, 2  ;;  %s2350_s12 = sand.u32 1, %s3956_s14  }
0x1112   : > { %p3958_p3 = scmp.ne.s32.totalorder %s3957_s16, 0  ;;  %s2351_s22 = scalar_lea.sflag [#allocation4], %s2350_s12 }
0x1114   : > { %p2899_p10 = pnand %p2903_p7, %p3958_p3 }
0x1116   : > { %3169 = dma.done.wait (!%p2899_p10), %s2351_s22, 128  }
0x1117   : > { %3171 = vsyncadd (!%p2899_p10), %s2351_s22, 4294967168  ;;  %s28_s13 = sadd.s32 1, %s3955_s17   ;;  %s3959_s21 = sld [smem:[#allocation9_spill]] }
0x1118   : > { %p25_p11 = scmp.ge.s32.totalorder %s28_s13, 6   ;;  %s3960_s22 = sld [smem:[#allocation10_spill]] }
0x1119   : > { %s3961_s23 = sld [smem:[#allocation20_spill]]  ;;  %s3962_s24 = sld [smem:[#allocation11_spill]] }
0x111a   : > { %s3963_s25 = sld [smem:[#allocation12_spill]]  ;;  %s3964_s26 = sld [smem:[#allocation19_spill]] }
0x111b   : > { %s3965_s27 = sld [smem:[#allocation14_spill]]  ;;  %s3966_s28 = sld [smem:[#allocation15_spill]] }
0x111c   : > { %s3967_s29 = sld [smem:[#allocation17_spill]]  ;;  %s3968_s30 = sld [smem:[#allocation18_spill]] }
0x111d   :  { %27 = sbr.rel (!%p25_p11) target bundleno = 19 (0x13), region = 157 }
0x1124   :  { %2356 = vsyncpa [#allocation3], 1 }
0x1125   :  { %2358 = vsyncpa [#allocation3 + $0x1], 1 }
0x1126   :  { %2359 = vsyncpa [#allocation4], 1 }
0x1127   :  { %2361 = vsyncpa [#allocation4 + $0x1], 1 }

</bundles_post_ra>
